<compile_context>
chip_gen: v7x
topology: tpu7x:2x2x1
jax: 0.10.0
libtpu: 0.0.40
codegen_flags: <defaults>
</compile_context>

<pallas_src>
import functools

import jax
import jax.numpy as jnp
from jax.experimental import pallas as pl
from jax.experimental.pallas import tpu as pltpu

NUM_GROUPS = 8
EPS = 1e-5
NEG_SLOPE = 0.2


def _leaky_relu(y):
    return jnp.where(y > 0, y, NEG_SLOPE * y)


def conv_block_kernel(*refs, Cin, Cout, W, HW, B, tap_dtype, has_p1, has_p2):
    it = iter(refs)
    x_ref = next(it)
    pvec_ref = next(it)
    p1_ref = next(it) if has_p1 else None
    p2_ref = next(it) if has_p2 else None
    selT_ref = next(it) if B > 1 else None
    sel_ref = next(it) if B > 1 else None
    masks_ref = next(it)
    w1_ref = next(it)
    w2_ref = next(it)
    wd_ref = next(it)
    o_ref = next(it)

    LW = B * HW
    x = x_ref[0]                               # (Cin, LW)  f32, samples along lanes
    pv = pvec_ref[...]                         # (Cmax, 8)  f32 packed per-channel params
    masks = masks_ref[...]                     # (9, LW)    tap-dtype boundary masks
    selT = selT_ref[...] if selT_ref is not None else None   # (LW, B) f32, 1/HW folded in
    sel = sel_ref[...] if sel_ref is not None else None      # (B, LW) f32 one-hot

    gn1_g = pv[:Cin, 0:1]
    gn1_b = pv[:Cin, 1:2]
    gn2_g = pv[:Cout, 2:3]
    gn2_b = pv[:Cout, 3:4]
    b1 = pv[:Cout, 4:5]
    b_out = pv[:Cout, 5:6]                     # conv2 bias + downsample bias (pre-summed)

    def group_norm(h, C, p_ref, gamma, beta):
        """Per-sample GroupNorm on a (C, B*HW) slab (stats in f32)."""
        cg = C // NUM_GROUPS
        xs = jnp.concatenate([h, h * h], axis=0)                          # (2C, LW)
        if B > 1:
            st = jnp.dot(xs, selT, preferred_element_type=jnp.float32)    # (2C, B) per-sample means
        else:
            st = jnp.sum(xs, axis=1, keepdims=True) * jnp.float32(1.0 / HW)
        if cg > 1:                                                        # group-average (cg==1: skip)
            st = jnp.dot(p_ref[...], st, preferred_element_type=jnp.float32)
        mean = st[:C]
        var = jnp.maximum(st[C:] - mean * mean, 0.0)                      # E[x^2]-m^2, clamped
        inv = jax.lax.rsqrt(var + EPS)
        a = inv * gamma                                                   # (C, B)
        c = beta - mean * a                                               # (C, B)
        if B > 1:
            acl = jnp.dot(jnp.concatenate([a, c], axis=0), sel,
                          preferred_element_type=jnp.float32)             # (2C, LW) broadcast back
            return h * acl[:C] + acl[C:]
        return h * a + c

    def conv3x3(h, w_ref):
        """3x3 / stride 1 / pad 1 conv on a (C, B*HW) slab as ONE im2col matmul.

        Taps are shifted copies along the lane axis (pltpu.roll); the precomputed boundary
        masks also kill any value that wrapped across a sample boundary, so batching along
        lanes is safe.  Masking/concat/matmul run in bf16 (f32 accumulate)."""
        taps = []
        for kh in range(3):
            for kw in range(3):
                shift = (kh - 1) * W + (kw - 1)
                t = kh * 3 + kw
                if shift == 0:
                    taps.append(h.astype(tap_dtype))
                else:
                    rolled = pltpu.roll(h, (-shift) % LW, axis=1)
                    taps.append(rolled.astype(tap_dtype) * masks[t:t + 1, :])
        slab = jnp.concatenate(taps, axis=0)                              # (9C, LW)
        if tap_dtype != jnp.bfloat16:
            slab = slab.astype(jnp.bfloat16)                              # v5e path: cast at MXU boundary
        return jnp.dot(w_ref[...], slab, preferred_element_type=jnp.float32)

    # --- conv path ---
    y = group_norm(x, Cin, p1_ref, gn1_g, gn1_b)
    y = _leaky_relu(y)
    y = conv3x3(y, w1_ref) + b1
    y = group_norm(y, Cout, p2_ref, gn2_g, gn2_b)
    y = _leaky_relu(y)
    y = conv3x3(y, w2_ref)

    # --- 1x1-conv (or identity) skip path on the raw input, kept in f32 ---
    ds = jnp.dot(wd_ref[...], x, preferred_element_type=jnp.float32)

    o_ref[0] = ds + y + b_out                  # (Cout, LW): lane-dense store


def conv_block(x_nchw, torch_params, *, bf16_taps=True, samples_per_step=None):
    """x_nchw: (N, Cin, H, W) f32.

    torch_params (PyTorch layouts), either
      (gn1_g, gn1_b, w1_oihw, b1, gn2_g, gn2_b, w2_oihw, b2, wd_oihw, bd)   # Cin != Cout
    or
      (gn1_g, gn1_b, w1_oihw, b1, gn2_g, gn2_b, w2_oihw, b2)                # Cin == Cout (identity skip)

    bf16_taps: keep True on v6e/v7x; set False on v5e (no bf16 VPU path).
    Returns (N, Cout, H, W) f32.
    """
    if len(torch_params) == 10:
        (gn1_g, gn1_b, w1_oihw, b1, gn2_g, gn2_b, w2_oihw, b2, wd_oihw, bd) = torch_params
    else:
        (gn1_g, gn1_b, w1_oihw, b1, gn2_g, gn2_b, w2_oihw, b2) = torch_params
        wd_oihw, bd = None, None

    N, Cin, H, W = x_nchw.shape
    Cout = w1_oihw.shape[0]
    HW = H * W
    assert Cin % NUM_GROUPS == 0 and Cout % NUM_GROUPS == 0

    # Per-step sample batch: largest divisor of N keeping the lane width modest.
    if samples_per_step is None:
        B = 1
        for b in range(1, N + 1):
            if N % b == 0 and b * HW <= 4096:
                B = b
    else:
        B = samples_per_step
        assert N % B == 0
    G = N // B
    LW = B * HW
    tap_dtype = jnp.bfloat16 if bf16_taps else jnp.float32

    # ---- im2col conv weights: OIHW -> (O, 9*I), tap-major, bf16 MXU operands ----
    def repack3x3(w):
        O, I = w.shape[0], w.shape[1]
        return jnp.transpose(w, (0, 2, 3, 1)).reshape(O, 9 * I).astype(jnp.bfloat16)

    w1 = repack3x3(w1_oihw)
    w2 = repack3x3(w2_oihw)

    # ---- skip path: 1x1 conv weight, or identity when Cin == Cout (PyTorch skips it) ----
    if wd_oihw is not None:
        wd = wd_oihw[:, :, 0, 0].astype(jnp.float32)
        bd_v = bd.astype(jnp.float32).reshape(-1)
    else:
        wd = jnp.eye(Cout, Cin, dtype=jnp.float32)
        bd_v = jnp.zeros((Cout,), jnp.float32)

    # ---- pack all per-channel vectors into ONE (Cmax, 8) f32 operand ----
    Cmax = max(Cin, Cout)

    def padcol(v, C):
        v = jnp.asarray(v, jnp.float32).reshape(-1)
        return jnp.pad(v, (0, Cmax - C))

    pvec = jnp.stack(
        [padcol(gn1_g, Cin), padcol(gn1_b, Cin),
         padcol(gn2_g, Cout), padcol(gn2_b, Cout),
         padcol(b1, Cout), padcol(jnp.asarray(b2, jnp.float32).reshape(-1) + bd_v, Cout),
         jnp.zeros((Cmax,), jnp.float32), jnp.zeros((Cmax,), jnp.float32)],
        axis=1)                                                    # (Cmax, 8)

    # ---- GroupNorm group-average matrices (1/cg folded in); skipped when cg == 1 ----
    def gn_fold(C):
        cg = C // NUM_GROUPS
        idx = jnp.arange(2 * C)
        half = idx // C
        grp = (idx % C) // cg
        m = (half[:, None] == half[None, :]) & (grp[:, None] == grp[None, :])
        return m.astype(jnp.float32) / jnp.float32(cg)

    has_p1 = (Cin // NUM_GROUPS) > 1
    has_p2 = (Cout // NUM_GROUPS) > 1
    P1 = gn_fold(Cin) if has_p1 else None
    P2 = gn_fold(Cout) if has_p2 else None

    # ---- per-sample lane selectors (reduce direction has 1/HW folded in) ----
    lane = jnp.arange(LW)
    samp = lane // HW
    sel = (samp[None, :] == jnp.arange(B)[:, None]).astype(jnp.float32)    # (B, LW)
    selT = jnp.transpose(sel) * jnp.float32(1.0 / HW)                      # (LW, B)

    # ---- 9 static boundary masks for the 3x3 taps (same for every sample) ----
    p = lane % HW
    hh = p // W
    ww = p % W
    mrows = []
    for kh in range(3):
        for kw in range(3):
            hs = hh + (kh - 1)
            ws = ww + (kw - 1)
            mrows.append((hs >= 0) & (hs < H) & (ws >= 0) & (ws < W))
    masks = jnp.stack(mrows, axis=0).astype(tap_dtype)                     # (9, LW)

    # ---- pack B samples along lanes: (N, Cin, H, W) -> (G, Cin, B*HW) ----
    x = x_nchw.astype(jnp.float32).reshape(G, B, Cin, HW)
    x = jnp.transpose(x, (0, 2, 1, 3)).reshape(G, Cin, LW)

    const2d = lambda shape: pl.BlockSpec(shape, lambda g: (0, 0))

    operands = [x, pvec]
    in_specs = [pl.BlockSpec((1, Cin, LW), lambda g: (g, 0, 0)), const2d((Cmax, 8))]
    if has_p1:
        operands.append(P1)
        in_specs.append(const2d((2 * Cin, 2 * Cin)))
    if has_p2:
        operands.append(P2)
        in_specs.append(const2d((2 * Cout, 2 * Cout)))
    if B > 1:
        operands += [selT, sel]
        in_specs += [const2d((LW, B)), const2d((B, LW))]
    operands += [masks, w1, w2, wd]
    in_specs += [const2d((9, LW)), const2d((Cout, 9 * Cin)),
                 const2d((Cout, 9 * Cout)), const2d((Cout, Cin))]

    flops = (2 * N * HW * Cout * (9 * Cin + 9 * Cout + Cin)
             + 4 * N * HW * (2 * Cin + 2 * Cout))          # convs + skip + GN reduce/broadcast
    transcendentals = N * (Cin + Cout)
    bytes_accessed = (4 * N * HW * (Cin + Cout)
                      + 2 * 9 * Cout * (Cin + Cout)
                      + 4 * Cout * Cin
                      + 4 * 8 * Cmax)

    kernel = functools.partial(conv_block_kernel, Cin=Cin, Cout=Cout, W=W, HW=HW, B=B,
                               tap_dtype=tap_dtype, has_p1=has_p1, has_p2=has_p2)

    out = pl.pallas_call(
        kernel,
        out_shape=jax.ShapeDtypeStruct((G, Cout, LW), jnp.float32),
        grid_spec=pltpu.PrefetchScalarGridSpec(
            num_scalar_prefetch=0,
            grid=(G,),
            in_specs=in_specs,
            out_specs=pl.BlockSpec((1, Cout, LW), lambda g: (g, 0, 0)),
        ),
        compiler_params=pltpu.CompilerParams(
            dimension_semantics=("parallel",),        # only helps v7x (2 TCs); sequential loop on v5e/v6e
            vmem_limit_bytes=32 * 1024 * 1024),       # tiny usage here; cap ~48 MiB on v7x if scaled up
        cost_estimate=pl.CostEstimate(
            flops=flops, transcendentals=transcendentals, bytes_accessed=bytes_accessed),
    )(*operands)

    out = out.reshape(G, Cout, B, HW)
    out = jnp.transpose(out, (0, 2, 1, 3)).reshape(N, Cout, H, W)
    return out


# ---------------- pure-JAX reference (for correctness check) ----------------
def _ref_group_norm(x_nchw, gamma, beta):
    N, C, H, W = x_nchw.shape
    cg = C // NUM_GROUPS
    xg = x_nchw.reshape(N, NUM_GROUPS, cg, H, W)
    mean = jnp.mean(xg, axis=(2, 3, 4), keepdims=True)
    var = jnp.mean((xg - mean) ** 2, axis=(2, 3, 4), keepdims=True)
    xn = ((xg - mean) / jnp.sqrt(var + EPS)).reshape(N, C, H, W)
    return xn * gamma.reshape(1, C, 1, 1) + beta.reshape(1, C, 1, 1)


def _ref_conv3x3(x_nchw, w_oihw, b):
    out = jax.lax.conv_general_dilated(
        x_nchw, w_oihw, window_strides=(1, 1), padding=((1, 1), (1, 1)),
        dimension_numbers=("NCHW", "OIHW", "NCHW"))
    return out + b.reshape(1, -1, 1, 1)


def _ref_conv_block(x, raw):
    (g1, be1, w1, b1, g2, be2, w2, b2, wd, bd) = raw
    y = _ref_group_norm(x, g1, be1)
    y = jnp.where(y > 0, y, NEG_SLOPE * y)
    y = _ref_conv3x3(y, w1, b1)
    y = _ref_group_norm(y, g2, be2)
    y = jnp.where(y > 0, y, NEG_SLOPE * y)
    y = _ref_conv3x3(y, w2, b2)
    ds = jax.lax.conv_general_dilated(
        x, wd, (1, 1), "VALID",
        dimension_numbers=("NCHW", "OIHW", "NCHW")) + bd.reshape(1, -1, 1, 1)
    return ds + y


if __name__ == "__main__":
    N, Cin, Cout, H, W = 2, 8, 16, 16, 16   # Cin/Cout multiples of the 8 GN groups

    key = jax.random.PRNGKey(0)
    ks = jax.random.split(key, 11)

    x = jax.random.normal(ks[0], (N, Cin, H, W), jnp.float32)

    # deterministic synthetic parameters (PyTorch layouts)
    gn1_g = jnp.ones((Cin,), jnp.float32) + 0.1 * jax.random.normal(ks[1], (Cin,))
    gn1_b = 0.1 * jax.random.normal(ks[2], (Cin,))
    w1_oihw = 0.1 * jax.random.normal(ks[3], (Cout, Cin, 3, 3), jnp.float32)
    b1 = 0.1 * jax.random.normal(ks[4], (Cout,))
    gn2_g = jnp.ones((Cout,), jnp.float32) + 0.1 * jax.random.normal(ks[5], (Cout,))
    gn2_b = 0.1 * jax.random.normal(ks[6], (Cout,))
    w2_oihw = 0.1 * jax.random.normal(ks[7], (Cout, Cout, 3, 3), jnp.float32)
    b2 = 0.1 * jax.random.normal(ks[8], (Cout,))
    wd_oihw = 0.1 * jax.random.normal(ks[9], (Cout, Cin, 1, 1), jnp.float32)
    bd = 0.1 * jax.random.normal(ks[10], (Cout,))

    params = (gn1_g, gn1_b, w1_oihw, b1, gn2_g, gn2_b, w2_oihw, b2, wd_oihw, bd)

    out = jax.block_until_ready(conv_block(x, params))
    ref = _ref_conv_block(x, params)

    assert out.shape == (N, Cout, H, W)
    # Conv matmuls use bf16 operands with f32 accumulation (deliberate precision trade for
    # the bf16-native MXUs), so the tolerance is relaxed vs. a pure-f32 forward.
    err = float(jnp.max(jnp.abs(out - ref)))
    assert jnp.allclose(out, ref, atol=2e-2, rtol=2e-2), f"max abs err = {err}"

    print("KERNEL_OK")
</pallas_src>

<mosaic_0001>
module attributes {stable_mosaic.version = 11 : i64} {
  func.func @conv_block_kernel(%arg0: i32, %arg1: memref<1x8x512xf32, #tpu.memory_space<vmem>>, %arg2: memref<16x8xf32, #tpu.memory_space<vmem>>, %arg3: memref<32x32xf32, #tpu.memory_space<vmem>>, %arg4: memref<512x2xf32, #tpu.memory_space<vmem>>, %arg5: memref<2x512xf32, #tpu.memory_space<vmem>>, %arg6: memref<9x512xbf16, #tpu.memory_space<vmem>>, %arg7: memref<16x72xbf16, #tpu.memory_space<vmem>>, %arg8: memref<16x144xbf16, #tpu.memory_space<vmem>>, %arg9: memref<16x8xf32, #tpu.memory_space<vmem>>, %arg10: memref<1x16x512xf32, #tpu.memory_space<vmem>>) attributes {dimension_semantics = [#tpu.dimension_semantics<parallel>], iteration_bounds = array<i64: 1>, scalar_prefetch = 0 : i64, scratch_operands = 0 : i64, tpu.core_type = #tpu.core_type<tc>, window_params = [{transform_indices = @transform_0, window_bounds = array<i64: 1, 8, 512>}, {pipeline_mode = #tpu.pipeline_mode<synchronous>, transform_indices = @transform_1, window_bounds = array<i64: 16, 8>}, {pipeline_mode = #tpu.pipeline_mode<synchronous>, transform_indices = @transform_2, window_bounds = array<i64: 32, 32>}, {pipeline_mode = #tpu.pipeline_mode<synchronous>, transform_indices = @transform_3, window_bounds = array<i64: 512, 2>}, {pipeline_mode = #tpu.pipeline_mode<synchronous>, transform_indices = @transform_4, window_bounds = array<i64: 2, 512>}, {pipeline_mode = #tpu.pipeline_mode<synchronous>, transform_indices = @transform_5, window_bounds = array<i64: 9, 512>}, {pipeline_mode = #tpu.pipeline_mode<synchronous>, transform_indices = @transform_6, window_bounds = array<i64: 16, 72>}, {pipeline_mode = #tpu.pipeline_mode<synchronous>, transform_indices = @transform_7, window_bounds = array<i64: 16, 144>}, {pipeline_mode = #tpu.pipeline_mode<synchronous>, transform_indices = @transform_8, window_bounds = array<i64: 16, 8>}, {transform_indices = @transform_9, window_bounds = array<i64: 1, 16, 512>}]} {
    %c0 = arith.constant 0 : index
    %c0_0 = arith.constant 0 : index
    %c0_1 = arith.constant 0 : index
    %0 = vector.load %arg1[%c0, %c0_0, %c0_1] : memref<1x8x512xf32, #tpu.memory_space<vmem>>, vector<1x8x512xf32>
    %1 = vector.shape_cast %0 : vector<1x8x512xf32> to vector<8x512xf32>
    %c0_2 = arith.constant 0 : index
    %c0_3 = arith.constant 0 : index
    %2 = vector.load %arg2[%c0_2, %c0_3] : memref<16x8xf32, #tpu.memory_space<vmem>>, vector<16x8xf32>
    %c0_4 = arith.constant 0 : index
    %c0_5 = arith.constant 0 : index
    %3 = vector.load %arg6[%c0_4, %c0_5] : memref<9x512xbf16, #tpu.memory_space<vmem>>, vector<9x512xbf16>
    %c0_6 = arith.constant 0 : index
    %c0_7 = arith.constant 0 : index
    %4 = vector.load %arg4[%c0_6, %c0_7] : memref<512x2xf32, #tpu.memory_space<vmem>>, vector<512x2xf32>
    %c0_8 = arith.constant 0 : index
    %c0_9 = arith.constant 0 : index
    %5 = vector.load %arg5[%c0_8, %c0_9] : memref<2x512xf32, #tpu.memory_space<vmem>>, vector<2x512xf32>
    %6 = vector.extract_strided_slice %2 {offsets = [0, 0], sizes = [8, 1], strides = [1, 1]} : vector<16x8xf32> to vector<8x1xf32>
    %7 = vector.extract_strided_slice %2 {offsets = [0, 1], sizes = [8, 1], strides = [1, 1]} : vector<16x8xf32> to vector<8x1xf32>
    %8 = vector.extract_strided_slice %2 {offsets = [0, 2], sizes = [16, 1], strides = [1, 1]} : vector<16x8xf32> to vector<16x1xf32>
    %9 = vector.extract_strided_slice %2 {offsets = [0, 3], sizes = [16, 1], strides = [1, 1]} : vector<16x8xf32> to vector<16x1xf32>
    %10 = vector.extract_strided_slice %2 {offsets = [0, 4], sizes = [16, 1], strides = [1, 1]} : vector<16x8xf32> to vector<16x1xf32>
    %11 = vector.extract_strided_slice %2 {offsets = [0, 5], sizes = [16, 1], strides = [1, 1]} : vector<16x8xf32> to vector<16x1xf32>
    %12 = arith.mulf %1, %1 : vector<8x512xf32>
    %13 = tpu.concatenate %1, %12 in 0 : vector<8x512xf32>, vector<8x512xf32> -> vector<16x512xf32>
    %cst = arith.constant dense<0.000000e+00> : vector<16x2xf32>
    %14 = tpu.matmul %13, %4, %cst {dimension_numbers = #tpu.dot_dimension_numbers<[1], [0], [0], [1], [0, 0, 1, 1], [], []>} : vector<16x512xf32>, vector<512x2xf32>, vector<16x2xf32> -> vector<16x2xf32>
    %15 = vector.extract_strided_slice %14 {offsets = [0, 0], sizes = [8, 2], strides = [1, 1]} : vector<16x2xf32> to vector<8x2xf32>
    %16 = vector.extract_strided_slice %14 {offsets = [8, 0], sizes = [8, 2], strides = [1, 1]} : vector<16x2xf32> to vector<8x2xf32>
    %17 = arith.mulf %15, %15 : vector<8x2xf32>
    %18 = arith.subf %16, %17 : vector<8x2xf32>
    %cst_10 = arith.constant 0.000000e+00 : f32
    %19 = vector.broadcast %cst_10 : f32 to vector<8x2xf32>
    %20 = arith.maximumf %18, %19 : vector<8x2xf32>
    %cst_11 = arith.constant 9.99999974E-6 : f32
    %21 = vector.broadcast %cst_11 : f32 to vector<8x2xf32>
    %22 = arith.addf %20, %21 : vector<8x2xf32>
    %23 = math.rsqrt %22 : vector<8x2xf32>
    %24 = vector.broadcast %6 : vector<8x1xf32> to vector<8x2xf32>
    %25 = arith.mulf %23, %24 : vector<8x2xf32>
    %26 = arith.mulf %15, %25 : vector<8x2xf32>
    %27 = vector.broadcast %7 : vector<8x1xf32> to vector<8x2xf32>
    %28 = arith.subf %27, %26 : vector<8x2xf32>
    %29 = tpu.concatenate %25, %28 in 0 : vector<8x2xf32>, vector<8x2xf32> -> vector<16x2xf32>
    %cst_12 = arith.constant dense<0.000000e+00> : vector<16x512xf32>
    %30 = tpu.matmul %29, %5, %cst_12 {dimension_numbers = #tpu.dot_dimension_numbers<[1], [0], [0], [1], [0, 0, 1, 1], [], []>} : vector<16x2xf32>, vector<2x512xf32>, vector<16x512xf32> -> vector<16x512xf32>
    %31 = vector.extract_strided_slice %30 {offsets = [0, 0], sizes = [8, 512], strides = [1, 1]} : vector<16x512xf32> to vector<8x512xf32>
    %32 = arith.mulf %1, %31 : vector<8x512xf32>
    %33 = vector.extract_strided_slice %30 {offsets = [8, 0], sizes = [8, 512], strides = [1, 1]} : vector<16x512xf32> to vector<8x512xf32>
    %34 = arith.addf %32, %33 : vector<8x512xf32>
    %cst_13 = arith.constant 0.000000e+00 : f32
    %35 = vector.broadcast %cst_13 : f32 to vector<8x512xf32>
    %36 = arith.cmpf ogt, %34, %35 : vector<8x512xf32>
    %cst_14 = arith.constant 2.000000e-01 : f32
    %37 = vector.broadcast %cst_14 : f32 to vector<8x512xf32>
    %38 = arith.mulf %37, %34 : vector<8x512xf32>
    %39 = arith.select %36, %34, %38 : vector<8x512xi1>, vector<8x512xf32>
    %c17_i32 = arith.constant 17 : i32
    %40 = tpu.dynamic_rotate %39 by %c17_i32 dim 1 : vector<8x512xf32>, i32 -> vector<8x512xf32>
    %41 = arith.truncf %40 : vector<8x512xf32> to vector<8x512xbf16>
    %42 = vector.extract_strided_slice %3 {offsets = [0, 0], sizes = [1, 512], strides = [1, 1]} : vector<9x512xbf16> to vector<1x512xbf16>
    %43 = vector.broadcast %42 : vector<1x512xbf16> to vector<8x512xbf16>
    %44 = arith.mulf %41, %43 : vector<8x512xbf16>
    %c16_i32 = arith.constant 16 : i32
    %45 = tpu.dynamic_rotate %39 by %c16_i32 dim 1 : vector<8x512xf32>, i32 -> vector<8x512xf32>
    %46 = arith.truncf %45 : vector<8x512xf32> to vector<8x512xbf16>
    %47 = vector.extract_strided_slice %3 {offsets = [1, 0], sizes = [1, 512], strides = [1, 1]} : vector<9x512xbf16> to vector<1x512xbf16>
    %48 = vector.broadcast %47 : vector<1x512xbf16> to vector<8x512xbf16>
    %49 = arith.mulf %46, %48 : vector<8x512xbf16>
    %c15_i32 = arith.constant 15 : i32
    %50 = tpu.dynamic_rotate %39 by %c15_i32 dim 1 : vector<8x512xf32>, i32 -> vector<8x512xf32>
    %51 = arith.truncf %50 : vector<8x512xf32> to vector<8x512xbf16>
    %52 = vector.extract_strided_slice %3 {offsets = [2, 0], sizes = [1, 512], strides = [1, 1]} : vector<9x512xbf16> to vector<1x512xbf16>
    %53 = vector.broadcast %52 : vector<1x512xbf16> to vector<8x512xbf16>
    %54 = arith.mulf %51, %53 : vector<8x512xbf16>
    %c1_i32 = arith.constant 1 : i32
    %55 = tpu.dynamic_rotate %39 by %c1_i32 dim 1 : vector<8x512xf32>, i32 -> vector<8x512xf32>
    %56 = arith.truncf %55 : vector<8x512xf32> to vector<8x512xbf16>
    %57 = vector.extract_strided_slice %3 {offsets = [3, 0], sizes = [1, 512], strides = [1, 1]} : vector<9x512xbf16> to vector<1x512xbf16>
    %58 = vector.broadcast %57 : vector<1x512xbf16> to vector<8x512xbf16>
    %59 = arith.mulf %56, %58 : vector<8x512xbf16>
    %60 = arith.truncf %39 : vector<8x512xf32> to vector<8x512xbf16>
    %c511_i32 = arith.constant 511 : i32
    %61 = tpu.dynamic_rotate %39 by %c511_i32 dim 1 : vector<8x512xf32>, i32 -> vector<8x512xf32>
    %62 = arith.truncf %61 : vector<8x512xf32> to vector<8x512xbf16>
    %63 = vector.extract_strided_slice %3 {offsets = [5, 0], sizes = [1, 512], strides = [1, 1]} : vector<9x512xbf16> to vector<1x512xbf16>
    %64 = vector.broadcast %63 : vector<1x512xbf16> to vector<8x512xbf16>
    %65 = arith.mulf %62, %64 : vector<8x512xbf16>
    %c497_i32 = arith.constant 497 : i32
    %66 = tpu.dynamic_rotate %39 by %c497_i32 dim 1 : vector<8x512xf32>, i32 -> vector<8x512xf32>
    %67 = arith.truncf %66 : vector<8x512xf32> to vector<8x512xbf16>
    %68 = vector.extract_strided_slice %3 {offsets = [6, 0], sizes = [1, 512], strides = [1, 1]} : vector<9x512xbf16> to vector<1x512xbf16>
    %69 = vector.broadcast %68 : vector<1x512xbf16> to vector<8x512xbf16>
    %70 = arith.mulf %67, %69 : vector<8x512xbf16>
    %c496_i32 = arith.constant 496 : i32
    %71 = tpu.dynamic_rotate %39 by %c496_i32 dim 1 : vector<8x512xf32>, i32 -> vector<8x512xf32>
    %72 = arith.truncf %71 : vector<8x512xf32> to vector<8x512xbf16>
    %73 = vector.extract_strided_slice %3 {offsets = [7, 0], sizes = [1, 512], strides = [1, 1]} : vector<9x512xbf16> to vector<1x512xbf16>
    %74 = vector.broadcast %73 : vector<1x512xbf16> to vector<8x512xbf16>
    %75 = arith.mulf %72, %74 : vector<8x512xbf16>
    %c495_i32 = arith.constant 495 : i32
    %76 = tpu.dynamic_rotate %39 by %c495_i32 dim 1 : vector<8x512xf32>, i32 -> vector<8x512xf32>
    %77 = arith.truncf %76 : vector<8x512xf32> to vector<8x512xbf16>
    %78 = vector.extract_strided_slice %3 {offsets = [8, 0], sizes = [1, 512], strides = [1, 1]} : vector<9x512xbf16> to vector<1x512xbf16>
    %79 = vector.broadcast %78 : vector<1x512xbf16> to vector<8x512xbf16>
    %80 = arith.mulf %77, %79 : vector<8x512xbf16>
    %81 = tpu.concatenate %44, %49, %54, %59, %60, %65, %70, %75, %80 in 0 : vector<8x512xbf16>, vector<8x512xbf16>, vector<8x512xbf16>, vector<8x512xbf16>, vector<8x512xbf16>, vector<8x512xbf16>, vector<8x512xbf16>, vector<8x512xbf16>, vector<8x512xbf16> -> vector<72x512xbf16>
    %c0_15 = arith.constant 0 : index
    %c0_16 = arith.constant 0 : index
    %82 = vector.load %arg7[%c0_15, %c0_16] : memref<16x72xbf16, #tpu.memory_space<vmem>>, vector<16x72xbf16>
    %cst_17 = arith.constant dense<0.000000e+00> : vector<16x512xf32>
    %83 = tpu.matmul %82, %81, %cst_17 {dimension_numbers = #tpu.dot_dimension_numbers<[1], [0], [0], [1], [0, 0, 1, 1], [], []>} : vector<16x72xbf16>, vector<72x512xbf16>, vector<16x512xf32> -> vector<16x512xf32>
    %84 = vector.broadcast %10 : vector<16x1xf32> to vector<16x512xf32>
    %85 = arith.addf %83, %84 : vector<16x512xf32>
    %86 = arith.mulf %85, %85 : vector<16x512xf32>
    %87 = tpu.concatenate %85, %86 in 0 : vector<16x512xf32>, vector<16x512xf32> -> vector<32x512xf32>
    %cst_18 = arith.constant dense<0.000000e+00> : vector<32x2xf32>
    %88 = tpu.matmul %87, %4, %cst_18 {dimension_numbers = #tpu.dot_dimension_numbers<[1], [0], [0], [1], [0, 0, 1, 1], [], []>} : vector<32x512xf32>, vector<512x2xf32>, vector<32x2xf32> -> vector<32x2xf32>
    %c0_19 = arith.constant 0 : index
    %c0_20 = arith.constant 0 : index
    %89 = vector.load %arg3[%c0_19, %c0_20] : memref<32x32xf32, #tpu.memory_space<vmem>>, vector<32x32xf32>
    %cst_21 = arith.constant dense<0.000000e+00> : vector<32x2xf32>
    %90 = tpu.matmul %89, %88, %cst_21 {dimension_numbers = #tpu.dot_dimension_numbers<[1], [0], [0], [1], [0, 0, 1, 1], [], []>} : vector<32x32xf32>, vector<32x2xf32>, vector<32x2xf32> -> vector<32x2xf32>
    %91 = vector.extract_strided_slice %90 {offsets = [0, 0], sizes = [16, 2], strides = [1, 1]} : vector<32x2xf32> to vector<16x2xf32>
    %92 = vector.extract_strided_slice %90 {offsets = [16, 0], sizes = [16, 2], strides = [1, 1]} : vector<32x2xf32> to vector<16x2xf32>
    %93 = arith.mulf %91, %91 : vector<16x2xf32>
    %94 = arith.subf %92, %93 : vector<16x2xf32>
    %cst_22 = arith.constant 0.000000e+00 : f32
    %95 = vector.broadcast %cst_22 : f32 to vector<16x2xf32>
    %96 = arith.maximumf %94, %95 : vector<16x2xf32>
    %cst_23 = arith.constant 9.99999974E-6 : f32
    %97 = vector.broadcast %cst_23 : f32 to vector<16x2xf32>
    %98 = arith.addf %96, %97 : vector<16x2xf32>
    %99 = math.rsqrt %98 : vector<16x2xf32>
    %100 = vector.broadcast %8 : vector<16x1xf32> to vector<16x2xf32>
    %101 = arith.mulf %99, %100 : vector<16x2xf32>
    %102 = arith.mulf %91, %101 : vector<16x2xf32>
    %103 = vector.broadcast %9 : vector<16x1xf32> to vector<16x2xf32>
    %104 = arith.subf %103, %102 : vector<16x2xf32>
    %105 = tpu.concatenate %101, %104 in 0 : vector<16x2xf32>, vector<16x2xf32> -> vector<32x2xf32>
    %cst_24 = arith.constant dense<0.000000e+00> : vector<32x512xf32>
    %106 = tpu.matmul %105, %5, %cst_24 {dimension_numbers = #tpu.dot_dimension_numbers<[1], [0], [0], [1], [0, 0, 1, 1], [], []>} : vector<32x2xf32>, vector<2x512xf32>, vector<32x512xf32> -> vector<32x512xf32>
    %107 = vector.extract_strided_slice %106 {offsets = [0, 0], sizes = [16, 512], strides = [1, 1]} : vector<32x512xf32> to vector<16x512xf32>
    %108 = arith.mulf %85, %107 : vector<16x512xf32>
    %109 = vector.extract_strided_slice %106 {offsets = [16, 0], sizes = [16, 512], strides = [1, 1]} : vector<32x512xf32> to vector<16x512xf32>
    %110 = arith.addf %108, %109 : vector<16x512xf32>
    %cst_25 = arith.constant 0.000000e+00 : f32
    %111 = vector.broadcast %cst_25 : f32 to vector<16x512xf32>
    %112 = arith.cmpf ogt, %110, %111 : vector<16x512xf32>
    %cst_26 = arith.constant 2.000000e-01 : f32
    %113 = vector.broadcast %cst_26 : f32 to vector<16x512xf32>
    %114 = arith.mulf %113, %110 : vector<16x512xf32>
    %115 = arith.select %112, %110, %114 : vector<16x512xi1>, vector<16x512xf32>
    %c17_i32_27 = arith.constant 17 : i32
    %116 = tpu.dynamic_rotate %115 by %c17_i32_27 dim 1 : vector<16x512xf32>, i32 -> vector<16x512xf32>
    %117 = arith.truncf %116 : vector<16x512xf32> to vector<16x512xbf16>
    %118 = vector.extract_strided_slice %3 {offsets = [0, 0], sizes = [1, 512], strides = [1, 1]} : vector<9x512xbf16> to vector<1x512xbf16>
    %119 = vector.broadcast %118 : vector<1x512xbf16> to vector<16x512xbf16>
    %120 = arith.mulf %117, %119 : vector<16x512xbf16>
    %c16_i32_28 = arith.constant 16 : i32
    %121 = tpu.dynamic_rotate %115 by %c16_i32_28 dim 1 : vector<16x512xf32>, i32 -> vector<16x512xf32>
    %122 = arith.truncf %121 : vector<16x512xf32> to vector<16x512xbf16>
    %123 = vector.extract_strided_slice %3 {offsets = [1, 0], sizes = [1, 512], strides = [1, 1]} : vector<9x512xbf16> to vector<1x512xbf16>
    %124 = vector.broadcast %123 : vector<1x512xbf16> to vector<16x512xbf16>
    %125 = arith.mulf %122, %124 : vector<16x512xbf16>
    %c15_i32_29 = arith.constant 15 : i32
    %126 = tpu.dynamic_rotate %115 by %c15_i32_29 dim 1 : vector<16x512xf32>, i32 -> vector<16x512xf32>
    %127 = arith.truncf %126 : vector<16x512xf32> to vector<16x512xbf16>
    %128 = vector.extract_strided_slice %3 {offsets = [2, 0], sizes = [1, 512], strides = [1, 1]} : vector<9x512xbf16> to vector<1x512xbf16>
    %129 = vector.broadcast %128 : vector<1x512xbf16> to vector<16x512xbf16>
    %130 = arith.mulf %127, %129 : vector<16x512xbf16>
    %c1_i32_30 = arith.constant 1 : i32
    %131 = tpu.dynamic_rotate %115 by %c1_i32_30 dim 1 : vector<16x512xf32>, i32 -> vector<16x512xf32>
    %132 = arith.truncf %131 : vector<16x512xf32> to vector<16x512xbf16>
    %133 = vector.extract_strided_slice %3 {offsets = [3, 0], sizes = [1, 512], strides = [1, 1]} : vector<9x512xbf16> to vector<1x512xbf16>
    %134 = vector.broadcast %133 : vector<1x512xbf16> to vector<16x512xbf16>
    %135 = arith.mulf %132, %134 : vector<16x512xbf16>
    %136 = arith.truncf %115 : vector<16x512xf32> to vector<16x512xbf16>
    %c511_i32_31 = arith.constant 511 : i32
    %137 = tpu.dynamic_rotate %115 by %c511_i32_31 dim 1 : vector<16x512xf32>, i32 -> vector<16x512xf32>
    %138 = arith.truncf %137 : vector<16x512xf32> to vector<16x512xbf16>
    %139 = vector.extract_strided_slice %3 {offsets = [5, 0], sizes = [1, 512], strides = [1, 1]} : vector<9x512xbf16> to vector<1x512xbf16>
    %140 = vector.broadcast %139 : vector<1x512xbf16> to vector<16x512xbf16>
    %141 = arith.mulf %138, %140 : vector<16x512xbf16>
    %c497_i32_32 = arith.constant 497 : i32
    %142 = tpu.dynamic_rotate %115 by %c497_i32_32 dim 1 : vector<16x512xf32>, i32 -> vector<16x512xf32>
    %143 = arith.truncf %142 : vector<16x512xf32> to vector<16x512xbf16>
    %144 = vector.extract_strided_slice %3 {offsets = [6, 0], sizes = [1, 512], strides = [1, 1]} : vector<9x512xbf16> to vector<1x512xbf16>
    %145 = vector.broadcast %144 : vector<1x512xbf16> to vector<16x512xbf16>
    %146 = arith.mulf %143, %145 : vector<16x512xbf16>
    %c496_i32_33 = arith.constant 496 : i32
    %147 = tpu.dynamic_rotate %115 by %c496_i32_33 dim 1 : vector<16x512xf32>, i32 -> vector<16x512xf32>
    %148 = arith.truncf %147 : vector<16x512xf32> to vector<16x512xbf16>
    %149 = vector.extract_strided_slice %3 {offsets = [7, 0], sizes = [1, 512], strides = [1, 1]} : vector<9x512xbf16> to vector<1x512xbf16>
    %150 = vector.broadcast %149 : vector<1x512xbf16> to vector<16x512xbf16>
    %151 = arith.mulf %148, %150 : vector<16x512xbf16>
    %c495_i32_34 = arith.constant 495 : i32
    %152 = tpu.dynamic_rotate %115 by %c495_i32_34 dim 1 : vector<16x512xf32>, i32 -> vector<16x512xf32>
    %153 = arith.truncf %152 : vector<16x512xf32> to vector<16x512xbf16>
    %154 = vector.extract_strided_slice %3 {offsets = [8, 0], sizes = [1, 512], strides = [1, 1]} : vector<9x512xbf16> to vector<1x512xbf16>
    %155 = vector.broadcast %154 : vector<1x512xbf16> to vector<16x512xbf16>
    %156 = arith.mulf %153, %155 : vector<16x512xbf16>
    %157 = tpu.concatenate %120, %125, %130, %135, %136, %141, %146, %151, %156 in 0 : vector<16x512xbf16>, vector<16x512xbf16>, vector<16x512xbf16>, vector<16x512xbf16>, vector<16x512xbf16>, vector<16x512xbf16>, vector<16x512xbf16>, vector<16x512xbf16>, vector<16x512xbf16> -> vector<144x512xbf16>
    %c0_35 = arith.constant 0 : index
    %c0_36 = arith.constant 0 : index
    %158 = vector.load %arg8[%c0_35, %c0_36] : memref<16x144xbf16, #tpu.memory_space<vmem>>, vector<16x144xbf16>
    %cst_37 = arith.constant dense<0.000000e+00> : vector<16x512xf32>
    %159 = tpu.matmul %158, %157, %cst_37 {dimension_numbers = #tpu.dot_dimension_numbers<[1], [0], [0], [1], [0, 0, 1, 1], [], []>} : vector<16x144xbf16>, vector<144x512xbf16>, vector<16x512xf32> -> vector<16x512xf32>
    %c0_38 = arith.constant 0 : index
    %c0_39 = arith.constant 0 : index
    %160 = vector.load %arg9[%c0_38, %c0_39] : memref<16x8xf32, #tpu.memory_space<vmem>>, vector<16x8xf32>
    %cst_40 = arith.constant dense<0.000000e+00> : vector<16x512xf32>
    %161 = tpu.matmul %160, %1, %cst_40 {dimension_numbers = #tpu.dot_dimension_numbers<[1], [0], [0], [1], [0, 0, 1, 1], [], []>} : vector<16x8xf32>, vector<8x512xf32>, vector<16x512xf32> -> vector<16x512xf32>
    %162 = arith.addf %161, %159 : vector<16x512xf32>
    %163 = vector.broadcast %11 : vector<16x1xf32> to vector<16x512xf32>
    %164 = arith.addf %162, %163 : vector<16x512xf32>
    %c0_41 = arith.constant 0 : index
    %c0_42 = arith.constant 0 : index
    %c0_43 = arith.constant 0 : index
    %165 = vector.load %arg10[%c0_41, %c0_42, %c0_43] : memref<1x16x512xf32, #tpu.memory_space<vmem>>, vector<1x16x512xf32>
    %166 = vector.shape_cast %165 : vector<1x16x512xf32> to vector<16x512xf32>
    %167 = vector.shape_cast %164 : vector<16x512xf32> to vector<1x16x512xf32>
    tpu.vector_store %arg10[%c0_41, %c0_42, %c0_43], %167 {strides = array<i32>} : memref<1x16x512xf32, #tpu.memory_space<vmem>>, vector<1x16x512xf32>,
    return
  }
  func.func @transform_0(%arg0: i32) -> (i32, i32, i32) {
    %c0_i32 = arith.constant 0 : i32
    %c0_i32_0 = arith.constant 0 : i32
    %c0_i32_1 = arith.constant 0 : i32
    return %arg0, %c0_i32, %c0_i32_0 : i32, i32, i32
  }
  func.func @transform_1(%arg0: i32) -> (i32, i32) {
    %c0_i32 = arith.constant 0 : i32
    %c0_i32_0 = arith.constant 0 : i32
    %c0_i32_1 = arith.constant 0 : i32
    return %c0_i32, %c0_i32_0 : i32, i32
  }
  func.func @transform_2(%arg0: i32) -> (i32, i32) {
    %c0_i32 = arith.constant 0 : i32
    %c0_i32_0 = arith.constant 0 : i32
    %c0_i32_1 = arith.constant 0 : i32
    return %c0_i32, %c0_i32_0 : i32, i32
  }
  func.func @transform_3(%arg0: i32) -> (i32, i32) {
    %c0_i32 = arith.constant 0 : i32
    %c0_i32_0 = arith.constant 0 : i32
    %c0_i32_1 = arith.constant 0 : i32
    return %c0_i32, %c0_i32_0 : i32, i32
  }
  func.func @transform_4(%arg0: i32) -> (i32, i32) {
    %c0_i32 = arith.constant 0 : i32
    %c0_i32_0 = arith.constant 0 : i32
    %c0_i32_1 = arith.constant 0 : i32
    return %c0_i32, %c0_i32_0 : i32, i32
  }
  func.func @transform_5(%arg0: i32) -> (i32, i32) {
    %c0_i32 = arith.constant 0 : i32
    %c0_i32_0 = arith.constant 0 : i32
    %c0_i32_1 = arith.constant 0 : i32
    return %c0_i32, %c0_i32_0 : i32, i32
  }
  func.func @transform_6(%arg0: i32) -> (i32, i32) {
    %c0_i32 = arith.constant 0 : i32
    %c0_i32_0 = arith.constant 0 : i32
    %c0_i32_1 = arith.constant 0 : i32
    return %c0_i32, %c0_i32_0 : i32, i32
  }
  func.func @transform_7(%arg0: i32) -> (i32, i32) {
    %c0_i32 = arith.constant 0 : i32
    %c0_i32_0 = arith.constant 0 : i32
    %c0_i32_1 = arith.constant 0 : i32
    return %c0_i32, %c0_i32_0 : i32, i32
  }
  func.func @transform_8(%arg0: i32) -> (i32, i32) {
    %c0_i32 = arith.constant 0 : i32
    %c0_i32_0 = arith.constant 0 : i32
    %c0_i32_1 = arith.constant 0 : i32
    return %c0_i32, %c0_i32_0 : i32, i32
  }
  func.func @transform_9(%arg0: i32) -> (i32, i32, i32) {
    %c0_i32 = arith.constant 0 : i32
    %c0_i32_0 = arith.constant 0 : i32
    %c0_i32_1 = arith.constant 0 : i32
    return %arg0, %c0_i32, %c0_i32_0 : i32, i32, i32
  }
}

</mosaic_0001>

<bundles_post_ra>
// kernel: tpu_custom_call.1
= control target key start
LH: loop header
LB: loop body
LE: loop exit
PB: predicated region body
PF: predicated region fallthrough
CT: control target
= control target key end

     0   :  { %v4046_v7 = vmov 0   ;;  %s4035_s0 = inlined_call_operand.vmem [shape: f32[1,8,512], index: 0, kind: input, shape index: {}]   ;;  %s4036_s1 = inlined_call_operand.vmem [shape: f32[16,8], index: 1, kind: input, shape index: {}]   ;;  %s4037_s2 = inlined_call_operand.vmem [shape: f32[32,32], index: 2, kind: input, shape index: {}]   ;;  %s4038_s3 = inlined_call_operand.vmem [shape: f32[512,2], index: 3, kind: input, shape index: {}]   ;;  %s4039_s4 = inlined_call_operand.vmem [shape: f32[2,512], index: 4, kind: input, shape index: {}]   ;;  %s4040_s5 = inlined_call_operand.vmem [shape: bf16[9,512], index: 5, kind: input, shape index: {}]   ;;  %s4041_s6 = inlined_call_operand.vmem [shape: bf16[16,72], index: 6, kind: input, shape index: {}]   ;;  %s4042_s7 = inlined_call_operand.vmem [shape: bf16[16,144], index: 7, kind: input, shape index: {}]   ;;  %s4043_s8 = inlined_call_operand.vmem [shape: f32[16,8], index: 8, kind: input, shape index: {}]   ;;  %s4044_s9 = inlined_call_operand.hbm [shape: f32[1,16,512], index: 9, kind: output, shape index: {}]  }
   0x1   :  { %v60_v0 = vld [vmem:[%s4038_s3 + $0x80] sm:$0xff]  ;;  %v61_v1 = vld [vmem:[%s4038_s3 + $0x88] sm:$0xff]  ;;  %2557 = vset.pattern.permute.xlu0 %v4046_v7  ;;  %v62_v12 = vld [vmem:[%s4038_s3 + $0x90] sm:$0xff] }
   0x2   :  { %v92_v2 = vld [vmem:[%s4038_s3 + $0x180] sm:$0xff]  ;;  %v2933_v3 = vpack.c.bf16 %v61_v1, %v60_v0  ;;  %v93_v4 = vld [vmem:[%s4038_s3 + $0x188] sm:$0xff]  ;;  %v63_v14 = vld [vmem:[%s4038_s3 + $0x98] sm:$0xff] }
   0x3   :  { %v44_v5 = vld [vmem:[%s4038_s3] sm:$0xff]  ;;  %v45_v6 = vld [vmem:[%s4038_s3 + $0x8] sm:$0xff]  ;;  %v2945_v8 = vpack.c.bf16 %v93_v4, %v92_v2  ;;  %v94_v15 = vld [vmem:[%s4038_s3 + $0x190] sm:$0xff]  ;;  %v2972_v17 = vpack.c.bf16 %v63_v14, %v62_v12 }
   0x4   :  { %v2947_v9 = vpack.c.bf16 %v45_v6, %v44_v5  ;;  %v76_v10 = vld [vmem:[%s4038_s3 + $0x100] sm:$0xff]  ;;  %v77_v11 = vld [vmem:[%s4038_s3 + $0x108] sm:$0xff]  ;;  %2399 = vmatprep.subr.bf16.mxu0 %v2933_v3  ;;  %v95_v16 = vld [vmem:[%s4038_s3 + $0x198] sm:$0xff] }
   0x5   :  { %4097 = vst [vmem:[#allocation5_spill] sm:$0xff] %v2945_v8  ;;  %v2959_v13 = vpack.c.bf16 %v77_v11, %v76_v10  ;;  %2431 = vmatprep.subr.bf16.mxu1 %v2945_v8  ;;  %4100 = vst [vmem:[#allocation8_spill] sm:$0xff] %v2972_v17  ;;  %v2974_v18 = vpack.c.bf16 %v95_v16, %v94_v15  ;;  %v46_v19 = vld [vmem:[%s4038_s3 + $0x10] sm:$0xff]  ;;  %v47_v20 = vld [vmem:[%s4038_s3 + $0x18] sm:$0xff] }
   0x6   :  { %4098 = vst [vmem:[#allocation6_spill] sm:$0xff] %v2947_v9  ;;  %2401 = vmatpush3.bf16.msra.mxu0 %v2947_v9  ;;  %v78_v21 = vld [vmem:[%s4038_s3 + $0x110] sm:$0xff]  ;;  %v2986_v22 = vpack.c.bf16 %v47_v20, %v46_v19  ;;  %v79_v23 = vld [vmem:[%s4038_s3 + $0x118] sm:$0xff]  ;;  %v64_v24 = vld [vmem:[%s4038_s3 + $0xa0] sm:$0xff] }
   0x7   :  { %4099 = vst [vmem:[#allocation7_spill] sm:$0xff] %v2959_v13  ;;  %4101 = vst [vmem:[#allocation9_spill] sm:$0xff] %v2974_v18  ;;  %2433 = vmatpush3.bf16.msra.mxu1 %v2959_v13  ;;  %v65_v25 = vld [vmem:[%s4038_s3 + $0xa8] sm:$0xff]  ;;  %2403 = vmatprep.subr.bf16.mxu0 %v2972_v17  ;;  %v2999_v26 = vpack.c.bf16 %v79_v23, %v78_v21  ;;  %v96_v28 = vld [vmem:[%s4038_s3 + $0x1a0] sm:$0xff] }
   0x8   :  { %4102 = vst [vmem:[#allocation10_spill] sm:$0xff] %v2986_v22  ;;  %2435 = vmatprep.subr.bf16.mxu1 %v2974_v18  ;;  %v3001_v27 = vpack.c.bf16 %v65_v25, %v64_v24  ;;  %v97_v29 = vld [vmem:[%s4038_s3 + $0x1a8] sm:$0xff]  ;;  %v48_v30 = vld [vmem:[%s4038_s3 + $0x20] sm:$0xff]  ;;  %v66_v36 = vld [vmem:[%s4038_s3 + $0xb0] sm:$0xff] }
   0x9   :  { %4103 = vst [vmem:[#allocation11_spill] sm:$0xff] %v2999_v26  ;;  %v3012_v31 = vpack.c.bf16 %v97_v29, %v96_v28  ;;  %v49_v32 = vld [vmem:[%s4038_s3 + $0x28] sm:$0xff]  ;;  %v80_v33 = vld [vmem:[%s4038_s3 + $0x120] sm:$0xff]  ;;  %v67_v37 = vld [vmem:[%s4038_s3 + $0xb8] sm:$0xff] }
   0xa   :  { %4104 = vst [vmem:[#allocation12_spill] sm:$0xff] %v3001_v27  ;;  %v81_v34 = vld [vmem:[%s4038_s3 + $0x128] sm:$0xff]  ;;  %2405 = vmatpush3.bf16.msra.mxu0 %v2986_v22  ;;  %v3024_v35 = vpack.c.bf16 %v49_v32, %v48_v30  ;;  %v98_v38 = vld [vmem:[%s4038_s3 + $0x1b0] sm:$0xff]  ;;  %v3039_v40 = vpack.c.bf16 %v67_v37, %v66_v36  ;;  %v99_v41 = vld [vmem:[%s4038_s3 + $0x1b8] sm:$0xff] }
   0xb   :  { %4105 = vst [vmem:[#allocation13_spill] sm:$0xff] %v3012_v31  ;;  %2437 = vmatpush3.bf16.msra.mxu1 %v2999_v26  ;;  %2407 = vmatprep.subr.bf16.mxu0 %v3001_v27  ;;  %v3037_v39 = vpack.c.bf16 %v81_v34, %v80_v33  ;;  %v50_v42 = vld [vmem:[%s4038_s3 + $0x30] sm:$0xff]  ;;  %v51_v43 = vld [vmem:[%s4038_s3 + $0x38] sm:$0xff]  ;;  %v3051_v44 = vpack.c.bf16 %v99_v41, %v98_v38  ;;  %v68_v47 = vld [vmem:[%s4038_s3 + $0xc0] sm:$0xff] }
   0xc   :  { %4106 = vst [vmem:[#allocation14_spill] sm:$0xff] %v3024_v35  ;;  %4108 = vst [vmem:[#allocation16_spill] sm:$0xff] %v3039_v40  ;;  %2439 = vmatprep.subr.bf16.mxu1 %v3012_v31  ;;  %v82_v45 = vld [vmem:[%s4038_s3 + $0x130] sm:$0xff]  ;;  %v83_v46 = vld [vmem:[%s4038_s3 + $0x138] sm:$0xff]  ;;  %v3072_v51 = vpack.c.bf16 %v51_v43, %v50_v42 }
   0xd   :  { %4107 = vst [vmem:[#allocation15_spill] sm:$0xff] %v3037_v39  ;;  %4109 = vst [vmem:[#allocation17_spill] sm:$0xff] %v3051_v44  ;;  %v69_v48 = vld [vmem:[%s4038_s3 + $0xc8] sm:$0xff]  ;;  %v100_v49 = vld [vmem:[%s4038_s3 + $0x1c0] sm:$0xff]  ;;  %v3076_v52 = vpack.c.bf16 %v83_v46, %v82_v45 }
   0xe   :  { %v101_v50 = vld [vmem:[%s4038_s3 + $0x1c8] sm:$0xff]  ;;  %2409 = vmatpush3.bf16.msra.mxu0 %v3024_v35  ;;  %4110 = vst [vmem:[#allocation18_spill] sm:$0xff] %v3072_v51  ;;  %v3078_v53 = vpack.c.bf16 %v69_v48, %v68_v47  ;;  %v52_v54 = vld [vmem:[%s4038_s3 + $0x40] sm:$0xff]  ;;  %v70_v59 = vld [vmem:[%s4038_s3 + $0xd0] sm:$0xff] }
   0xf   :  { %2441 = vmatpush3.bf16.msra.mxu1 %v3037_v39  ;;  %2411 = vmatprep.subr.bf16.mxu0 %v3039_v40  ;;  %4111 = vst [vmem:[#allocation19_spill] sm:$0xff] %v3076_v52  ;;  %v53_v55 = vld [vmem:[%s4038_s3 + $0x48] sm:$0xff]  ;;  %v84_v56 = vld [vmem:[%s4038_s3 + $0x140] sm:$0xff]  ;;  %v3090_v57 = vpack.c.bf16 %v101_v50, %v100_v49  ;;  %v71_v60 = vld [vmem:[%s4038_s3 + $0xd8] sm:$0xff] }
  0x10   :  { %4112 = vst [vmem:[#allocation20_spill] sm:$0xff] %v3078_v53  ;;  %2443 = vmatprep.subr.bf16.mxu1 %v3051_v44  ;;  %v85_v58 = vld [vmem:[%s4038_s3 + $0x148] sm:$0xff]  ;;  %v102_v61 = vld [vmem:[%s4038_s3 + $0x1d0] sm:$0xff]  ;;  %v103_v62 = vld [vmem:[%s4038_s3 + $0x1d8] sm:$0xff]  ;;  %v3108_v63 = vpack.c.bf16 %v53_v55, %v52_v54  ;;  %v3117_v2 = vpack.c.bf16 %v71_v60, %v70_v59 }
  0x11   :  { %4113 = vst [vmem:[#allocation21_spill] sm:$0xff] %v3090_v57  ;;  %v54_v0 = vld [vmem:[%s4038_s3 + $0x50] sm:$0xff]  ;;  %v3115_v1 = vpack.c.bf16 %v85_v58, %v84_v56  ;;  %v55_v4 = vld [vmem:[%s4038_s3 + $0x58] sm:$0xff]  ;;  %v3129_v10 = vpack.c.bf16 %v103_v62, %v102_v61  ;;  %v72_v11 = vld [vmem:[%s4038_s3 + $0xe0] sm:$0xff] }
  0x12   :  { %2413 = vmatpush3.bf16.msra.mxu0 %v3072_v51  ;;  %4114 = vst [vmem:[#allocation22_spill] sm:$0xff] %v3108_v63  ;;  %4116 = vst [vmem:[#allocation24_spill] sm:$0xff] %v3117_v2  ;;  %v86_v5 = vld [vmem:[%s4038_s3 + $0x150] sm:$0xff]  ;;  %v87_v6 = vld [vmem:[%s4038_s3 + $0x158] sm:$0xff]  ;;  %v3150_v20 = vpack.c.bf16 %v55_v4, %v54_v0 }
  0x13   :  { %2445 = vmatpush3.bf16.msra.mxu1 %v3076_v52  ;;  %2415 = vmatprep.subr.bf16.mxu0 %v3078_v53  ;;  %4115 = vst [vmem:[#allocation23_spill] sm:$0xff] %v3115_v1  ;;  %4117 = vst [vmem:[#allocation25_spill] sm:$0xff] %v3129_v10  ;;  %v73_v12 = vld [vmem:[%s4038_s3 + $0xe8] sm:$0xff]  ;;  %v104_v14 = vld [vmem:[%s4038_s3 + $0x1e0] sm:$0xff]  ;;  %v3163_v25 = vpack.c.bf16 %v87_v6, %v86_v5 }
  0x14   :  { %2447 = vmatprep.subr.bf16.mxu1 %v3090_v57  ;;  %v105_v15 = vld [vmem:[%s4038_s3 + $0x1e8] sm:$0xff]  ;;  %v56_v16 = vld [vmem:[%s4038_s3 + $0x60] sm:$0xff]  ;;  %4118 = vst [vmem:[#allocation26_spill] sm:$0xff] %v3150_v20  ;;  %v74_v24 = vld [vmem:[%s4038_s3 + $0xf0] sm:$0xff]  ;;  %v3165_v28 = vpack.c.bf16 %v73_v12, %v72_v11 }
  0x15   :  { %v57_v19 = vld [vmem:[%s4038_s3 + $0x68] sm:$0xff]  ;;  %v88_v21 = vld [vmem:[%s4038_s3 + $0x160] sm:$0xff]  ;;  %4119 = vst [vmem:[#allocation27_spill] sm:$0xff] %v3163_v25  ;;  %v75_v29 = vld [vmem:[%s4038_s3 + $0xf8] sm:$0xff]  ;;  %v3181_v33 = vpack.c.bf16 %v105_v15, %v104_v14 }
  0x16   :  { %2417 = vmatpush3.bf16.msra.mxu0 %v3108_v63  ;;  %v89_v23 = vld [vmem:[%s4038_s3 + $0x168] sm:$0xff]  ;;  %4120 = vst [vmem:[#allocation28_spill] sm:$0xff] %v3165_v28  ;;  %v3178_v32 = vld [vmem:[%s4035_s0 + $0x18] sm:$0xff]  ;;  %v106_v34 = vld [vmem:[%s4038_s3 + $0x1f0] sm:$0xff]  ;;  %v3198_v38 = vpack.c.bf16 %v57_v19, %v56_v16 }
  0x17   :  { %2449 = vmatpush3.bf16.msra.mxu1 %v3115_v1  ;;  %2419 = vmatprep.subr.bf16.mxu0 %v3117_v2  ;;  %v3173_v30 = vld [vmem:[%s4035_s0 + $0x8] sm:$0xff]  ;;  %4121 = vst [vmem:[#allocation29_spill] sm:$0xff] %v3181_v33  ;;  %v107_v36 = vld [vmem:[%s4038_s3 + $0x1f8] sm:$0xff]  ;;  %v3193_v37 = vld [vmem:[%s4036_s1] sm:$0xff] }
  0x18   :  { %2451 = vmatprep.subr.bf16.mxu1 %v3129_v10  ;;  %177 = vmatprep.mubr.f32.mxu0 %v3173_v30  ;;  %4122 = vst [vmem:[#allocation30_spill] sm:$0xff] %v3198_v38 }
  0x19   :  { %252 = vmatprep.mubr.f32.mxu1 %v3178_v32  ;;  %270 = vperm.xlu0 %2557, %v3193_v37  }
  0x1a   :  { %2421 = vmatpush3.bf16.msra.mxu0 %v3150_v20 }
  0x1b   :  { %14 = vsyncpa [#allocation3], 0  ;;  %2453 = vmatpush3.bf16.msra.mxu1 %v3163_v25  ;;  %2423 = vmatprep.subr.bf16.mxu0 %v3165_v28  ;;  %v3202_v41 = vpack.c.bf16 %v89_v23, %v88_v21  ;;  %v3204_v42 = vpack.c.bf16 %v75_v29, %v74_v24  ;;  %v58_v43 = vld [vmem:[%s4038_s3 + $0x70] sm:$0xff]  ;;  %v59_v45 = vld [vmem:[%s4038_s3 + $0x78] sm:$0xff]  ;;  %v3213_v46 = vpack.c.bf16 %v107_v36, %v106_v34  ;;  %v2856_v49 = vmov 1   ;;  %s2860_s22 = smov 16  }
  0x1c   :  { %2455 = vmatprep.subr.bf16.mxu1 %v3181_v33  ;;  %v90_v47 = vld [vmem:[%s4038_s3 + $0x170] sm:$0xff]  ;;  %v91_v48 = vld [vmem:[%s4038_s3 + $0x178] sm:$0xff]  ;;  %v3222_v50 = vpack.c.bf16 %v59_v45, %v58_v43  ;;  %v3234_v55 = vld [vmem:[%s4035_s0] sm:$0xff]  ;;  %v110_v56 = vmul.f32 %v3173_v30, %v3173_v30  ;;  %v112_v59 = vmul.f32 %v3178_v32, %v3178_v32  ;;  %v4045_v62 = vlaneseq  ;;  %s2861_s23 = smov 1   ;;  %s2862_s24 = smov 15  }
  0x1d   :  { %4123 = vst [vmem:[#allocation31_spill] sm:$0xff] %v3202_v41  ;;  %4124 = vst [vmem:[#allocation32_spill] sm:$0xff] %v3204_v42  ;;  %2558 = vset.pattern.permute.xlu0 %v2856_v49  ;;  %v3227_v54 = vpack.c.bf16 %v91_v48, %v90_v47  ;;  %v3242_v58 = vld [vmem:[%s4035_s0 + $0x10] sm:$0xff]  ;;  %v109_v60 = vmul.f32 %v3234_v55, %v3234_v55  ;;  %v2857_v0 = vmov 1983009808   ;;  %v108_v5 = vld [vmem:[%s4039_s4] sm:$0xff] }
  0x1e   :  { %4125 = vst [vmem:[#allocation33_spill] sm:$0xff] %v3213_v46  ;;  %2425 = vmatpush3.bf16.msra.mxu0 %v3198_v38  ;;  %4126 = vst [vmem:[#allocation34_spill] sm:$0xff] %v3222_v50  ;;  %276 = vperm.xlu0 %2558, %v3193_v37   ;;  %v111_v61 = vmul.f32 %v3242_v58, %v3242_v58  ;;  %v283_v4 = vunpack.c.l.s4 %v2857_v0  ;;  %v3256_v6 = vshrl.u32 %v4045_v62, 7  ;;  %vm305_vm0 = vcmask 1041408   ;;  %s2859_s4 = smov 17   ;;  %s2863_s25 = smov 127  }
  0x1f   :  { %2457 = vmatpush3.bf16.msra.mxu1 %v3202_v41  ;;  %2427 = vmatprep.subr.bf16.mxu0 %v3204_v42  ;;  %4127 = vst [vmem:[#allocation35_spill] sm:$0xff] %v3227_v54  ;;  %v281_v14 = vcombine.high %v108_v5, %v108_v5  ;;  %v4048_v23 = vmov 0.0   ;;  %vm298_vm1 = vcmask 15360   ;;  %s2864_s26 = smov 112   ;;  %s2865_s27 = smov 113   ;;  %vm878_vm11 = vcmask 1043456  }
  0x20   :  { %2459 = vmatprep.subr.bf16.mxu1 %v3213_v46  ;;  %v284_v11 = vunpack.c.0.s8 %v283_v4  ;;  %s2866_s28 = smov 111   ;;  %vm959_vm15 = vcmask 588800  }
  0x22   :  { %2429 = vmatpush3.bf16.msra.mxu0 %v3222_v50  ;;  %v287_v12 = vsub.s32 %v284_v11, %v3256_v6 }
  0x23   :  { %2461 = vmatpush3.bf16.msra.mxu1 %v3227_v54 }
  0x24   :  { %v3259_v15 = vrot.slane %v108_v5, %v287_v12  ;;  %v3261_v16 = vrot.slane %v281_v14, %v287_v12 }
  0x25   :  { %178 = vmatmul.mubr.f32.vlgmr.msra.gmra.mrb[0].mxu0 %v3234_v55 }
  0x26   :  { %253 = vmatmul.mubr.f32.vlgmr.msra.gmra.mrb[0].mxu1 %v3242_v58  ;;  %182 = vmatprep.mubr.f32.mxu0 %v110_v56  ;;  %4128 = vst [vmem:[#allocation36_spill] sm:$0xff] %v3259_v15  ;;  %4129 = vst [vmem:[#allocation37_spill] sm:$0xff] %v3261_v16  ;;  %v3265_v19 = vcombine.high %v3259_v15, %v3259_v15  ;;  %v3269_v21 = vcombine.high %v3261_v16, %v3261_v16 }
  0x27   :  { %257 = vmatprep.mubr.f32.mxu1 %v112_v59 }
  0x28   :  { %4130 = vst [vmem:[#allocation38_spill] sm:$0xff] %v3265_v19  ;;  %4131 = vst [vmem:[#allocation39_spill] sm:$0xff] %v3269_v21  ;;  %2167 = vmatprep.subr.msk.mxu0 %vm305_vm0, %v3265_v19  ;;  %2171 = vmatprep.subr.msk.mxu1 %vm305_vm0, %v3269_v21 }
  0x29   :  { %183 = vmatmul.mubr.f32.gmra.mrb[2].mxu0 %v109_v60  ;;  %2172 = vmatpush1.msk.msra.mxu1 %vm305_vm0, %v3261_v16 }
  0x2a   :  { %258 = vmatmul.mubr.f32.gmra.mrb[2].mxu1 %v111_v61  ;;  %2168 = vmatpush1.msk.msra.mxu0 %vm305_vm0, %v3259_v15 }
  0x2b   :  { %378 = vmatprep.mubr.f32.mxu0 %v4048_v23  ;;  %455 = vmatprep.mubr.f32.mxu1 %v4048_v23 }
  0x98   :  { %v271_v14 = vpop.permute.xlu0 %270 }
  0xf8   :  { %v2244_v24 = vpop.f32.mrb[0].mxu0 }
  0xf9   :  { %v2282_v29 = vpop.f32.mrb[0].mxu1  ;;  %v2245_v34 = vpop.f32.mrb[1].mxu0 }
  0xfa   :  { %v2246_v36 = vadd.f32 %v2245_v34, %v2244_v24  ;;  %v2283_v43 = vpop.f32.mrb[1].mxu1  ;;  %v277_v24 = vpop.permute.xlu0 %276 }
  0xfb   :  { %v2284_v45 = vadd.f32 %v2283_v43, %v2282_v29 }
  0xfc   :  { %v2247_v47 = vpop.f32.mrb[2].mxu0 }
  0xfd   :  { %v255_v48 = vadd.f32 %v2284_v45, %v2246_v36  ;;  %v2285_v49 = vpop.f32.mrb[2].mxu1  ;;  %v2248_v56 = vpop.f32.mrb[3].mxu0  ;;  %v4132_v36 = vmov 0  }
  0xfe   :  { %v2249_v59 = vadd.f32 %v2248_v56, %v2247_v47  ;;  %v2286_v60 = vpop.f32.mrb[3].mxu1 }
  0xff   :  { %v2287_v61 = vadd.f32 %v2286_v60, %v2285_v49  ;;  %v263_v0 = vmul.f32 %v255_v48, %v255_v48 }
 0x101   :  { %v260_v4 = vadd.f32 %v2287_v61, %v2249_v59 }
 0x103   :  { %v264_v5 = vsub.f32 %v260_v4, %v263_v0 }
 0x105   :  { %v265_v11 = vmax.f32 %v264_v5, 0.0 }
 0x107   :  { %v266_v12 = vadd.f32 1e-05, %v265_v11 }
 0x109   :  { %2819 = vrsqrt.f32 %v266_v12 }
 0x113   :  { %v2820_v62 = vpop.eup %2819 }
 0x114   :  { %v273_v7 = vmul.f32 %v2820_v62, %v271_v14 }
 0x116   :  { %2169 = vmatmul.mubr.msk.f32.vlgmr.msra.gmra.mrb[4].mxu0 %vm298_vm1, %v273_v7  ;;  %2173 = vmatmul.mubr.msk.f32.vlgmr.msra.gmra.mrb[4].mxu1 %vm298_vm1, %v273_v7  ;;  %v274_v29 = vmul.f32 %v273_v7, %v255_v48 }
 0x117   :  { %384 = vmatprep.mubr.f32.mxu0 %v4048_v23  ;;  %461 = vmatprep.mubr.f32.mxu1 %v4048_v23 }
 0x118   :  { %v279_v34 = vsub.f32 %v277_v24, %v274_v29 }
 0x11a   :  { %2170 = vmatmul.mubr.msk.f32.gmra.mrb[6].mxu0 %vm298_vm1, %v279_v34  ;;  %2174 = vmatmul.mubr.msk.f32.gmra.mrb[6].mxu1 %vm298_vm1, %v279_v34 }
 0x11b   :  { %1007 = vmatprep.mubr.bf16.mxu0 %v4132_v36  ;;  %1050 = vmatprep.mubr.bf16.mxu1 %v4132_v36 }
 0x1e9   :  { %v380_v62 = vpop.f32.mrb[4].mxu0  ;;  %v457_v43 = vpop.f32.mrb[4].mxu1 }
 0x1ea   :  { %v382_v45 = vpop.f32.mrb[5].mxu0  ;;  %v459_v47 = vpop.f32.mrb[5].mxu1  ;;  %v468_v49 = vmul.f32 %v380_v62, %v3234_v55  ;;  %v470_v7 = vmul.f32 %v457_v43, %v3242_v58  ;;  %v3324_v43 = vld [vmem:[%s4036_s1 + $0x8] sm:$0xff] }
 0x1eb   :  { %v469_v48 = vmul.f32 %v382_v45, %v3173_v30  ;;  %v471_v56 = vmul.f32 %v459_v47, %v3178_v32  ;;  %4133 = vst [vmem:[#allocation40_spill] sm:$0xff] %v3324_v43  ;;  %v2867_v45 = vmov 4   ;;  %v40_v47 = vld [vmem:[%s4040_s5] sm:$0xff] }
 0x1ec   :  { %2639 = vset.pattern.permute.xlu1 %v2867_v45  ;;  %2640 = vset.pattern.permute.xlu0 %v2867_v45  ;;  %v732_v45 = vsub.s32 3, %v3256_v6 }
 0x1ed   :  { %v386_v59 = vpop.f32.mrb[6].mxu0  ;;  %v463_v60 = vpop.f32.mrb[6].mxu1 }
 0x1ee   :  { %v472_v61 = vadd.f32 %v468_v49, %v386_v59  ;;  %v474_v0 = vadd.f32 %v470_v7, %v463_v60  ;;  %v388_v4 = vpop.f32.mrb[7].mxu0  ;;  %v465_v5 = vpop.f32.mrb[7].mxu1  ;;  %v41_v49 = vld [vmem:[%s4040_s5 + $0x8] sm:$0xff]  ;;  %v2176_v7 = vcombine.high %v40_v47, %v40_v47  ;;  %v2175_v59 = vcombine.low %v40_v47, %v40_v47 }
 0x1ef   :  { %v473_v11 = vadd.f32 %v469_v48, %v388_v4  ;;  %v475_v12 = vadd.f32 %v471_v56, %v465_v5  ;;  %v2178_v48 = vcombine.high %v41_v49, %v41_v49  ;;  %v2177_v56 = vcombine.low %v41_v49, %v41_v49 }
 0x1f0   :  { %vm476_vm2 = vcmp.gt.f32.partialorder %v472_v61, 0.0  ;;  %v480_v14 = vmul.f32 0.2, %v472_v61  ;;  %vm478_vm3 = vcmp.gt.f32.partialorder %v474_v0, 0.0  ;;  %v482_v24 = vmul.f32 0.2, %v474_v0 }
 0x1f1   :  { %vm477_vm4 = vcmp.gt.f32.partialorder %v473_v11, 0.0  ;;  %v481_v55 = vmul.f32 0.2, %v473_v11  ;;  %vm479_vm5 = vcmp.gt.f32.partialorder %v475_v12, 0.0  ;;  %v483_v58 = vmul.f32 0.2, %v475_v12 }
 0x1f2   :  { %v3293_v29 = vsel %vm476_vm2, %v472_v61, %v480_v14  ;;  %v3295_v30 = vsel %vm478_vm3, %v474_v0, %v482_v24  ;;  %v573_v60 = vshrl.u32 %v2176_v7, 16  ;;  %v587_v61 = vshrl.u32 %v2178_v48, 16 }
 0x1f3   :  { %v3297_v32 = vsel %vm477_vm4, %v473_v11, %v481_v55  ;;  %v3299_v34 = vsel %vm479_vm5, %v475_v12, %v483_v58  ;;  %v580_v0 = vshrl.u32 %v2177_v56, 16  ;;  %v566_v4 = vshrl.u32 %v2175_v59, 16 }
 0x1f4   :  { %v2574_v36 = vpack.i.bf16 %v3299_v34, %v3295_v30  ;;  %v2559_v62 = vpack.i.bf16 %v3297_v32, %v3293_v29  ;;  %v4134_v5 = vlaneseq  ;;  %v3338_v11 = vsub.s32 0, %v3256_v6 }
 0x1f5   :  { %v539_v12 = vpack.i.b16 %v2178_v48, %v2178_v48  ;;  %v574_v14 = vpack.i.b16 %v573_v60, %v573_v60  ;;  %v617_v24 = vsub.s32 1, %v3256_v6  ;;  %v588_v55 = vpack.i.b16 %v587_v61, %v587_v61  ;;  %v43_v61 = vld [vmem:[%s4040_s5 + $0x18] sm:$0x11] }
 0x1f6   :  { %2575 = vrot.lane.b32.xlu0 %v2574_v36, %s2859_s4  ;;  %2560 = vrot.lane.b32.xlu1 %v2559_v62, %s2860_s22  ;;  %v525_v58 = vpack.i.b16 %v2176_v7, %v2176_v7  ;;  %v581_v47 = vpack.i.b16 %v580_v0, %v580_v0  ;;  %v567_v49 = vpack.i.b16 %v566_v4, %v566_v4  ;;  %vm1243_vm2 = vcmask 261120  }
 0x1f7   :  { %v3348_v48 = vrot.slane %v574_v14, %v3338_v11  ;;  %v3351_v60 = vrot.slane %v588_v55, %v3338_v11  ;;  %v3368_v23 = vrot.slane %v539_v12, %v617_v24  ;;  %v3386_v54 = vrot.slane %v574_v14, %v617_v24 }
 0x1f8   :  { %v3354_v7 = vrot.slane %v525_v58, %v3338_v11  ;;  %v3373_v15 = vrot.slane %v581_v47, %v3338_v11  ;;  %v3388_v16 = vrot.slane %v581_v47, %v617_v24  ;;  %v2181_v46 = vcombine.low %v43_v61, %v43_v61 }
 0x1f9   :  { %4136 = vst [vmem:[#allocation42_spill] sm:$0xff] %v3348_v48  ;;  %4137 = vst [vmem:[#allocation43_spill] sm:$0xff] %v3351_v60  ;;  %v3392_v42 = vrot.slane %v525_v58, %v617_v24  ;;  %v3396_v41 = vrot.slane %v567_v49, %v617_v24  ;;  %v2182_v28 = vcombine.high %v43_v61, %v43_v61 }
 0x1fa   :  { %2585 = vrot.lane.b32.xlu0 %v2574_v36, %s2861_s23  ;;  %2565 = vrot.lane.b32.xlu1 %v2574_v36, %s2860_s22  ;;  %4139 = vst [vmem:[#allocation45_spill] sm:$0xff] %v3368_v23  ;;  %4140 = vst [vmem:[#allocation46_spill] sm:$0xff] %v3373_v15  ;;  %v3408_v50 = vrot.slane %v581_v47, %v732_v45  ;;  %v3411_v57 = vrot.slane %v525_v58, %v732_v45 }
 0x1fb   :  { %4141 = vst [vmem:[#allocation47_spill] sm:$0xff] %v3386_v54  ;;  %4142 = vst [vmem:[#allocation48_spill] sm:$0xff] %v3388_v16  ;;  %v3413_v53 = vrot.slane %v574_v14, %v732_v45  ;;  %v829_v61 = vpack.i.b16 %v2181_v46, %v2181_v46  ;;  %v3417_v40 = vrot.slane %v539_v12, %v732_v45 }
 0x1fe   :  { %2595 = vrot.lane.b32.xlu0 %v2574_v36, %s2862_s24  ;;  %2570 = vrot.lane.b32.xlu1 %v2559_v62, %s2859_s4 }
 0x202   :  { %2605 = vrot.lane.b32.xlu0 %v2574_v36, %s2863_s25  ;;  %2580 = vrot.lane.b32.xlu1 %v2559_v62, %s2861_s23 }
 0x206   :  { %2615 = vrot.lane.b32.xlu0 %v2574_v36, %s2864_s26  ;;  %2590 = vrot.lane.b32.xlu1 %v2559_v62, %s2862_s24 }
 0x20a   :  { %2625 = vrot.lane.b32.xlu0 %v2574_v36, %s2865_s27  ;;  %2600 = vrot.lane.b32.xlu1 %v2559_v62, %s2863_s25 }
 0x20e   :  { %2635 = vrot.lane.b32.xlu0 %v2574_v36, %s2866_s28  ;;  %2610 = vrot.lane.b32.xlu1 %v2559_v62, %s2864_s26  ;;  %v532_v36 = vpack.i.b16 %v2177_v56, %v2177_v56  ;;  %v3356_v56 = vrot.slane %v588_v55, %v617_v24 }
 0x210   :  { %4138 = vst [vmem:[#allocation44_spill] sm:$0xff] %v3356_v56  ;;  %v3363_v0 = vrot.slane %v532_v36, %v3338_v11  ;;  %v3394_v21 = vrot.slane %v532_v36, %v617_v24 }
 0x212   :  { %2620 = vrot.lane.b32.xlu1 %v2559_v62, %s2865_s27  ;;  %951 = vperm.xlu0 %2640, %v3324_v43   ;;  %v42_v43 = vld [vmem:[%s4040_s5 + $0x10] sm:$0x11] }
 0x213   :  { %v2180_v33 = vcombine.high %v42_v43, %v42_v43  ;;  %v2179_v25 = vcombine.low %v42_v43, %v42_v43 }
 0x215   :  { %v815_v39 = vpack.i.b16 %v2179_v25, %v2179_v25  ;;  %v3431_v25 = vrot.slane %v829_v61, %v3338_v11 }
 0x216   :  { %2630 = vrot.lane.b32.xlu1 %v2559_v62, %s2866_s28  ;;  %v518_v62 = vpack.i.b16 %v2175_v59, %v2175_v59  ;;  %v695_v59 = vsub.s32 2, %v3256_v6  ;;  %v3376_v6 = vrot.slane %v567_v49, %v3338_v11 }
 0x218   :  { %v3366_v4 = vrot.slane %v518_v62, %v3338_v11  ;;  %v3398_v19 = vrot.slane %v581_v47, %v695_v59  ;;  %v3400_v38 = vrot.slane %v518_v62, %v617_v24  ;;  %v3402_v20 = vrot.slane %v574_v14, %v695_v59 }
 0x219   :  { %v3404_v10 = vrot.slane %v588_v55, %v695_v59  ;;  %v3406_v2 = vrot.slane %v567_v49, %v695_v59  ;;  %v3415_v24 = vrot.slane %v532_v36, %v732_v45  ;;  %v822_v59 = vpack.i.b16 %v2180_v33, %v2180_v33 }
 0x21a   :  { %946 = vperm.xlu1 %2639, %v3193_v37   ;;  %v3335_v37 = vand.u32 127, %v4134_v5  ;;  %v3345_v5 = vrot.slane %v539_v12, %v3338_v11  ;;  %4143 = vst [vmem:[#allocation49_spill] sm:$0xff] %v3402_v20  ;;  %v836_v47 = vpack.i.b16 %v2182_v28, %v2182_v28  ;;  %v3423_v14 = vrot.slane %v588_v55, %v732_v45 }
 0x21b   :  { %v3425_v36 = vrot.slane %v518_v62, %v732_v45  ;;  %v3435_v62 = vrot.slane %v822_v59, %v3338_v11 }
 0x21c   :  { %vm498_vm6 = vcmp.lt.s32.totalorder %v3335_v37, 17  ;;  %vm557_vm7 = vcmp.lt.s32.totalorder %v3335_v37, 16  ;;  %4135 = vst [vmem:[#allocation41_spill] sm:$0xff] %v3345_v5  ;;  %vm643_vm8 = vcmp.lt.s32.totalorder %v3335_v37, 1  ;;  %vm606_vm9 = vcmp.lt.s32.totalorder %v3335_v37, 15 }
 0x21d   :  { %vm684_vm10 = vcmp.lt.s32.totalorder %v3335_v37, 127  ;;  %vm758_vm12 = vcmp.lt.s32.totalorder %v3335_v37, 112  ;;  %vm721_vm13 = vcmp.lt.s32.totalorder %v3335_v37, 113  ;;  %vm795_vm14 = vcmp.lt.s32.totalorder %v3335_v37, 111  ;;  %v2827_v37 = vld [vmem:[%s4035_s0 + $0x8] sm:$0xff] }
 0x268   :  { %v2576_v1 = vpop.permute.xlu0 %2575  ;;  %v2561_v63 = vpop.permute.xlu1 %2560 }
 0x269   :  { %v2578_v43 = vunpack.i.h.bf16 %v2576_v1  ;;  %v2577_v52 = vunpack.i.l.bf16 %v2576_v1  ;;  %v2563_v51 = vunpack.i.h.bf16 %v2561_v63  ;;  %v2562_v44 = vunpack.i.l.bf16 %v2561_v63 }
 0x26a   :  { %v3428_v63 = vrot.slane %v567_v49, %v732_v45 }
 0x26b   :  { %v499_v35 = vsel %vm498_vm6, %v2577_v52, %v2578_v43  ;;  %v560_v58 = vsel %vm557_vm7, %v2562_v44, %v2563_v51 }
 0x26c   :  { %v506_v46 = vpack.c.bf16 %v499_v35, %v499_v35  ;;  %v563_v31 = vpack.c.bf16 %v560_v58, %v560_v58  ;;  %v2586_v1 = vpop.permute.xlu0 %2585  ;;  %v2566_v27 = vpop.permute.xlu1 %2565  ;;  %v3438_v35 = vrot.slane %v836_v47, %v3338_v11  ;;  %v3441_v58 = vrot.slane %v815_v39, %v3338_v11 }
 0x26d   :  { %v2588_v28 = vunpack.i.h.bf16 %v2586_v1  ;;  %v2587_v33 = vunpack.i.l.bf16 %v2586_v1  ;;  %v2568_v12 = vunpack.i.h.bf16 %v2566_v27  ;;  %v2567_v26 = vunpack.i.l.bf16 %v2566_v27 }
 0x26e   :  { %v595_v55 = vmul.bf16 %v3348_v48, %v563_v31  ;;  %v548_v39 = vmul.bf16 %v3345_v5, %v506_v46 }
 0x26f   :  { %v3445_v45 = vsel %vm643_vm8, %v2587_v33, %v2588_v28  ;;  %v558_v49 = vsel %vm557_vm7, %v2567_v26, %v2568_v12  ;;  %v559_v27 = vsel %vm557_vm7, %v2563_v51, %v2567_v26  ;;  %v561_v31 = vsel %vm557_vm7, %v2568_v12, %v2562_v44 }
 0x270   :  { %v562_v61 = vpack.c.bf16 %v561_v31, %v561_v31  ;;  %v564_v59 = vpack.c.bf16 %v559_v27, %v559_v27  ;;  %v565_v47 = vpack.c.bf16 %v558_v49, %v558_v49  ;;  %v2596_v1 = vpop.permute.xlu0 %2595  ;;  %v2571_v48 = vpop.permute.xlu1 %2570  ;;  %v651_v13 = vpack.c.bf16 %v3445_v45, %v3445_v45 }
 0x271   :  { %v2598_v11 = vunpack.i.h.bf16 %v2596_v1  ;;  %v2597_v22 = vunpack.i.l.bf16 %v2596_v1  ;;  %v2573_v18 = vunpack.i.h.bf16 %v2571_v48  ;;  %v2572_v17 = vunpack.i.l.bf16 %v2571_v48 }
 0x272   :  { %v597_v26 = vmul.bf16 %v3351_v60, %v565_v47  ;;  %v851_v51 = vrot.slane %v595_v55, 4  ;;  %v596_v44 = vmul.bf16 %v3373_v15, %v564_v59  ;;  %v594_v55 = vmul.bf16 %v3376_v6, %v562_v61 }
 0x273   :  { %v607_v12 = vsel %vm606_vm9, %v2597_v22, %v2598_v11  ;;  %v500_v46 = vsel %vm498_vm6, %v2573_v18, %v2577_v52  ;;  %v501_v49 = vsel %vm498_vm6, %v2572_v17, %v2573_v18  ;;  %v502_v48 = vsel %vm498_vm6, %v2578_v43, %v2572_v17 }
 0x274   :  { %v614_v27 = vpack.c.bf16 %v607_v12, %v607_v12  ;;  %v505_v31 = vpack.c.bf16 %v500_v46, %v500_v46  ;;  %v504_v45 = vpack.c.bf16 %v501_v49, %v501_v49  ;;  %v2606_v1 = vpop.permute.xlu0 %2605  ;;  %v2581_v47 = vpop.permute.xlu1 %2580  ;;  %v503_v52 = vpack.c.bf16 %v502_v48, %v502_v48 }
 0x275   :  { %v2608_v59 = vunpack.i.h.bf16 %v2606_v1  ;;  %v2607_v15 = vunpack.i.l.bf16 %v2606_v1  ;;  %v2583_v60 = vunpack.i.h.bf16 %v2581_v47  ;;  %v2582_v5 = vunpack.i.l.bf16 %v2581_v47 }
 0x276   :  { %v853_v9 = vrot.slane %v597_v26, 4  ;;  %v546_v18 = vmul.bf16 %v3354_v7, %v504_v45  ;;  %v547_v8 = vmul.bf16 %v3363_v0, %v505_v31  ;;  %v852_v12 = vrot.slane %v596_v44, 4 }
 0x277   :  { %v3473_v17 = vsel %vm684_vm10, %v2607_v15, %v2608_v59  ;;  %v3477_v43 = vsel %vm643_vm8, %v2583_v60, %v2587_v33  ;;  %v3481_v61 = vsel %vm643_vm8, %v2588_v28, %v2582_v5  ;;  %v646_v49 = vsel %vm643_vm8, %v2582_v5, %v2583_v60 }
 0x278   :  { %v650_v46 = vpack.c.bf16 %v3477_v43, %v3477_v43  ;;  %v648_v48 = vpack.c.bf16 %v3481_v61, %v3481_v61  ;;  %v3491_v31 = vpop.permute.xlu0 %2615  ;;  %v2591_v33 = vpop.permute.xlu1 %2590  ;;  %v893_v45 = vsel %vm878_vm11, %v548_v39, %v853_v9  ;;  %v885_v43 = vsel %vm878_vm11, %v546_v18, %v851_v51 }
 0x279   :  { %v4091_v28 = vunpack.i.h.bf16 %v3491_v31  ;;  %v2617_v44 = vunpack.i.l.bf16 %v3491_v31  ;;  %v2593_v1 = vunpack.i.h.bf16 %v2591_v33  ;;  %1018 = vmatprep.subr.bf16.mxu1 %v893_v45  ;;  %v2592_v47 = vunpack.i.l.bf16 %v2591_v33  ;;  %975 = vmatprep.subr.bf16.mxu0 %v885_v43 }
 0x27a   :  { %v889_v5 = vsel %vm878_vm11, %v547_v8, %v852_v12  ;;  %v545_v60 = vmul.bf16 %v3366_v4, %v503_v52  ;;  %v649_v61 = vpack.c.bf16 %v646_v49, %v646_v49  ;;  %v850_v45 = vrot.slane %v594_v55, 4 }
 0x27b   :  { %v3504_v9 = vsel %vm758_vm12, %v2617_v44, %v4091_v28  ;;  %v608_v39 = vsel %vm606_vm9, %v2593_v1, %v2597_v22  ;;  %1019 = vmatpush1.bf16.msra.mxu1 %v889_v5  ;;  %v609_v8 = vsel %vm606_vm9, %v2592_v47, %v2593_v1  ;;  %v610_v52 = vsel %vm606_vm9, %v2598_v11, %v2592_v47 }
 0x27c   :  { %v634_v18 = vmul.bf16 %v3368_v23, %v614_v27  ;;  %v3515_v12 = vpop.permute.xlu0 %2625  ;;  %v2601_v49 = vpop.permute.xlu1 %2600  ;;  %v613_v33 = vpack.c.bf16 %v608_v39, %v608_v39  ;;  %v612_v26 = vpack.c.bf16 %v609_v8, %v609_v8  ;;  %v881_v22 = vsel %vm878_vm11, %v545_v60, %v850_v45 }
 0x27d   :  { %v671_v55 = vmul.bf16 %v3356_v56, %v651_v13  ;;  %976 = vmatpush1.bf16.msra.mxu0 %v881_v22  ;;  %v2628_v43 = vunpack.i.h.bf16 %v3515_v12  ;;  %v2627_v5 = vunpack.i.l.bf16 %v3515_v12  ;;  %v2603_v1 = vunpack.i.h.bf16 %v2601_v49 }
 0x27e   :  { %v2602_v51 = vunpack.i.l.bf16 %v2601_v49  ;;  %v611_v28 = vpack.c.bf16 %v610_v52, %v610_v52  ;;  %v632_v27 = vmul.bf16 %v3392_v42, %v612_v26  ;;  %v669_v47 = vmul.bf16 %v3386_v54, %v649_v61 }
 0x27f   :  { %v861_v11 = vrot.slane %v671_v55, 4  ;;  %v3525_v39 = vsel %vm721_vm13, %v2627_v5, %v2628_v43  ;;  %v686_v13 = vsel %vm684_vm10, %v2603_v1, %v2607_v15  ;;  %v633_v49 = vmul.bf16 %v3394_v21, %v613_v33 }
 0x280   :  { %v687_v60 = vsel %vm684_vm10, %v2602_v51, %v2603_v1  ;;  %v688_v45 = vsel %vm684_vm10, %v2608_v59, %v2602_v51  ;;  %v2636_v8 = vpop.permute.xlu0 %2635  ;;  %v2611_v52 = vpop.permute.xlu1 %2610  ;;  %v690_v61 = vpack.c.bf16 %v686_v13, %v686_v13  ;;  %v859_v23 = vrot.slane %v669_v47, 4 }
 0x281   :  { %v909_v12 = vsel %vm878_vm11, %v634_v18, %v861_v11  ;;  %v689_v22 = vpack.c.bf16 %v687_v60, %v687_v60  ;;  %v2638_v55 = vunpack.i.h.bf16 %v2636_v8  ;;  %v2637_v15 = vunpack.i.l.bf16 %v2636_v8 }
 0x282   :  { %1020 = vmatprep.subr.bf16.mxu1 %v909_v12  ;;  %v2613_v56 = vunpack.i.h.bf16 %v2611_v52  ;;  %v692_v54 = vpack.c.bf16 %v688_v45, %v688_v45  ;;  %v2612_v1 = vunpack.i.l.bf16 %v2611_v52  ;;  %v670_v59 = vmul.bf16 %v3388_v16, %v650_v46 }
 0x283   :  { %v3540_v51 = vsel %vm795_vm14, %v2637_v15, %v2638_v55  ;;  %v668_v11 = vmul.bf16 %v3396_v41, %v648_v48  ;;  %v710_v13 = vmul.bf16 %v3402_v20, %v690_v61  ;;  %v631_v46 = vmul.bf16 %v3400_v38, %v611_v28 }
 0x284   :  { %v760_v18 = vsel %vm758_vm12, %v2613_v56, %v2617_v44  ;;  %v2621_v33 = vpop.permute.xlu1 %2620  ;;  %v761_v47 = vsel %vm758_vm12, %v2612_v1, %v2613_v56  ;;  %v4144_v8 = vunpack.i.h.bf16 %v3491_v31  ;;  %v901_v48 = vsel %vm878_vm11, %v632_v27, %v859_v23 }
 0x285   :  { %v764_v45 = vpack.c.bf16 %v760_v18, %v760_v18  ;;  %v763_v44 = vpack.c.bf16 %v761_v47, %v761_v47  ;;  %v860_v12 = vrot.slane %v670_v59, 4  ;;  %977 = vmatprep.subr.bf16.mxu0 %v901_v48  ;;  %v858_v61 = vrot.slane %v668_v11, 4 }
 0x286   :  { %v762_v52 = vsel %vm758_vm12, %v4144_v8, %v2612_v1  ;;  %v2623_v26 = vunpack.i.h.bf16 %v2621_v33  ;;  %v2622_v20 = vunpack.i.l.bf16 %v2621_v33  ;;  %v867_v60 = vrot.slane %v710_v13, 4 }
 0x287   :  { %v905_v18 = vsel %vm878_vm11, %v633_v49, %v860_v12  ;;  %v712_v56 = vmul.bf16 %v3404_v10, %v692_v54  ;;  %v709_v28 = vmul.bf16 %v3406_v2, %v689_v22  ;;  %v4145_v31 = vpack.c.bf16 %v3473_v17, %v3473_v17 }
 0x288   :  { %v2631_v16 = vpop.permute.xlu1 %2630  ;;  %1021 = vmatpush1.bf16.msra.mxu1 %v905_v18  ;;  %v897_v23 = vsel %vm878_vm11, %v631_v46, %v858_v61  ;;  %v723_v27 = vsel %vm721_vm13, %v2623_v26, %v2627_v5  ;;  %v724_v59 = vsel %vm721_vm13, %v2622_v20, %v2623_v26  ;;  %v725_v54 = vsel %vm721_vm13, %v2628_v43, %v2622_v20 }
 0x289   :  { %v711_v1 = vmul.bf16 %v3398_v19, %v4145_v31  ;;  %v766_v49 = vpack.c.bf16 %v762_v52, %v762_v52  ;;  %978 = vmatpush1.bf16.msra.mxu0 %v897_v23  ;;  %v727_v22 = vpack.c.bf16 %v723_v27, %v723_v27  ;;  %v729_v11 = vpack.c.bf16 %v725_v54, %v725_v54 }
 0x28a   :  { %v4146_v17 = vpack.c.bf16 %v3297_v32, %v3297_v32  ;;  %v869_v13 = vrot.slane %v712_v56, 4  ;;  %v2633_v47 = vunpack.i.h.bf16 %v2631_v16  ;;  %v2632_v46 = vunpack.i.l.bf16 %v2631_v16 }
 0x28b   :  { %v866_v5 = vrot.slane %v709_v28, 4  ;;  %v726_v8 = vpack.c.bf16 %v724_v59, %v724_v59  ;;  %v868_v48 = vrot.slane %v711_v1, 4  ;;  %v747_v26 = vmul.bf16 %v3411_v57, %v727_v22 }
 0x28c   :  { %v917_v33 = vsel %vm878_vm11, %v4146_v17, %v867_v60  ;;  %v784_v20 = vmul.bf16 %v3413_v53, %v764_v45  ;;  %v4147_v43 = vpack.c.bf16 %v3299_v34, %v3299_v34  ;;  %v797_v32 = vsel %vm795_vm14, %v2633_v47, %v2637_v15 }
 0x28d   :  { %979 = vmatprep.subr.bf16.mxu0 %v917_v33  ;;  %v798_v60 = vsel %vm795_vm14, %v2632_v46, %v2633_v47  ;;  %v799_v16 = vsel %vm795_vm14, %v2638_v55, %v2632_v46  ;;  %v801_v12 = vpack.c.bf16 %v797_v32, %v797_v32  ;;  %v4148_v45 = vpack.c.bf16 %v3293_v29, %v3293_v29  ;;  %v4158_v32 = vld [vmem:[#allocation10_spill] sm:$0xff] }
 0x28e   :  { %v925_v52 = vsel %vm878_vm11, %v4147_v43, %v869_v13  ;;  %v800_v61 = vpack.c.bf16 %v798_v60, %v798_v60  ;;  %v803_v18 = vpack.c.bf16 %v799_v16, %v799_v16  ;;  %v4149_v56 = vpack.c.bf16 %v3295_v30, %v3295_v30  ;;  %v4156_v43 = vld [vmem:[#allocation8_spill] sm:$0xff]  ;;  %v4159_v60 = vld [vmem:[#allocation11_spill] sm:$0xff] }
 0x28f   :  { %1022 = vmatprep.subr.bf16.mxu1 %v925_v52  ;;  %v913_v34 = vsel %vm878_vm11, %v4148_v45, %v866_v5  ;;  %v875_v28 = vrot.slane %v784_v20, 4  ;;  %v749_v31 = vmul.bf16 %v3417_v40, %v729_v11  ;;  %v786_v55 = vmul.bf16 %v3423_v14, %v766_v49  ;;  %v4155_v20 = vld [vmem:[#allocation7_spill] sm:$0xff]  ;;  %v4157_v52 = vld [vmem:[#allocation9_spill] sm:$0xff]  ;;  %v4160_v16 = vld [vmem:[#allocation12_spill] sm:$0xff] }
 0x290   :  { %980 = vmatpush1.bf16.msra.mxu0 %v913_v34  ;;  %v921_v15 = vsel %vm878_vm11, %v4149_v56, %v868_v48  ;;  %v746_v1 = vmul.bf16 %v3425_v36, %v726_v8  ;;  %v783_v23 = vmul.bf16 %v3428_v63, %v763_v44  ;;  %v4150_v29 = vpack.c.bf16 %v3525_v39, %v3525_v39  ;;  %v2815_v48 = vld [vmem:[%s4041_s6] sm:$0xff]   ;;  %v4166_v34 = vld [vmem:[#allocation18_spill] sm:$0xff]  ;;  %v4167_v56 = vld [vmem:[#allocation19_spill] sm:$0xff] }
 0x291   :  { %1023 = vmatpush1.bf16.msra.mxu1 %v921_v15  ;;  %v4151_v30 = vpack.c.bf16 %v3504_v9, %v3504_v9  ;;  %v933_v54 = vsel %vm878_vm11, %v747_v26, %v875_v28  ;;  %v877_v22 = vrot.slane %v786_v55, 4  ;;  %v843_v49 = vmul.bf16 %v3435_v62, %v801_v12  ;;  %v4154_v26 = vld [vmem:[#allocation6_spill] sm:$0xff]  ;;  %v4161_v12 = vld [vmem:[#allocation13_spill] sm:$0xff]  ;;  %v4168_v15 = vld [vmem:[#allocation20_spill] sm:$0xff] }
 0x292   :  { %v748_v27 = vmul.bf16 %v3415_v24, %v4150_v29  ;;  %981 = vmatprep.subr.bf16.mxu0 %v933_v54  ;;  %v874_v11 = vrot.slane %v783_v23, 4  ;;  %v845_v44 = vmul.bf16 %v3438_v35, %v803_v18  ;;  %v842_v33 = vmul.bf16 %v3441_v58, %v800_v61  ;;  %v4163_v61 = vld [vmem:[#allocation15_spill] sm:$0xff]  ;;  %v4164_v18 = vld [vmem:[#allocation16_spill] sm:$0xff]  ;;  %v4165_v45 = vld [vmem:[#allocation17_spill] sm:$0xff] }
 0x293   :  { %v785_v59 = vmul.bf16 %v3408_v50, %v4151_v30  ;;  %v941_v39 = vsel %vm878_vm11, %v749_v31, %v877_v22  ;;  %v4152_v47 = vpack.c.bf16 %v3540_v51, %v3540_v51  ;;  %v4153_v51 = vld [vmem:[#allocation5_spill] sm:$0xff]  ;;  %v4170_v31 = vld [vmem:[#allocation22_spill] sm:$0xff]  ;;  %v4171_v55 = vld [vmem:[#allocation23_spill] sm:$0xff] }
 0x294   :  { %1024 = vmatprep.subr.bf16.mxu1 %v941_v39  ;;  %v929_v13 = vsel %vm878_vm11, %v746_v1, %v874_v11  ;;  %v964_v5 = vsel %vm878_vm11, %v842_v33, 0  ;;  %v4169_v28 = vld [vmem:[#allocation21_spill] sm:$0xff]  ;;  %v4172_v1 = vld [vmem:[#allocation24_spill] sm:$0xff]  ;;  %v4174_v29 = vld [vmem:[#allocation26_spill] sm:$0xff]  ;;  %v952_v39 = vpop.permute.xlu0 %951 }
 0x295   :  { %v876_v17 = vrot.slane %v785_v59, 4  ;;  %v844_v46 = vmul.bf16 %v3431_v25, %v4152_v47  ;;  %982 = vmatpush1.bf16.msra.mxu0 %v929_v13  ;;  %v4173_v23 = vld [vmem:[#allocation25_spill] sm:$0xff]  ;;  %v4176_v30 = vld [vmem:[#allocation28_spill] sm:$0xff]  ;;  %v4178_v54 = vld [vmem:[#allocation30_spill] sm:$0xff] }
 0x296   :  { %2184 = vmatprep.subr.msk.bf16.mxu0 %vm878_vm11, %v843_v49  ;;  %v4177_v59 = vld [vmem:[#allocation29_spill] sm:$0xff]  ;;  %v4179_v22 = vld [vmem:[#allocation31_spill] sm:$0xff]  ;;  %v4180_v49 = vld [vmem:[#allocation32_spill] sm:$0xff] }
 0x297   :  { %v937_v9 = vsel %vm878_vm11, %v748_v27, %v876_v17  ;;  %v970_v8 = vsel %vm878_vm11, %v844_v46, 0  ;;  %v4175_v27 = vld [vmem:[#allocation27_spill] sm:$0xff]  ;;  %v4181_v11 = vld [vmem:[#allocation33_spill] sm:$0xff]  ;;  %v4182_v17 = vld [vmem:[#allocation34_spill] sm:$0xff] }
 0x298   :  { %1025 = vmatpush1.bf16.msra.mxu1 %v937_v9 }
 0x299   :  { %2186 = vmatprep.subr.msk.bf16.mxu1 %vm878_vm11, %v845_v44  ;;  %984 = vmatpush1.bf16.msra.mxu0 %v964_v5  ;;  %v4183_v44 = vld [vmem:[#allocation35_spill] sm:$0xff]  ;;  %v947_v33 = vpop.permute.xlu1 %946 }
 0x29a   :  { %2463 = vmatprep.subr.bf16.mxu0 %v2933_v3  ;;  %v4162_v3 = vld [vmem:[#allocation14_spill] sm:$0xff] }
 0x29c   :  { %1027 = vmatpush1.bf16.msra.mxu1 %v970_v8  ;;  %2185 = vmatmul.mubr.msk.bf16.vlgmr.msra.gmra.mrb[8].mxu0 %vm959_vm15, %v2815_v48 }
 0x29d   :  { %2495 = vmatprep.subr.bf16.mxu1 %v4153_v51  ;;  %2465 = vmatpush3.bf16.msra.mxu0 %v4154_v26 }
 0x29e   :  { %2467 = vmatprep.subr.bf16.mxu0 %v4156_v43 }
 0x29f   :  { %2187 = vmatmul.mubr.msk.bf16.vlgmr.msra.gmra.mrb[8].mxu1 %vm959_vm15, %v2815_v48 }
 0x2a0   :  { %2497 = vmatpush3.bf16.msra.mxu1 %v4155_v20 }
 0x2a1   :  { %2499 = vmatprep.subr.bf16.mxu1 %v4157_v52  ;;  %2469 = vmatpush3.bf16.msra.mxu0 %v4158_v32 }
 0x2a2   :  { %2471 = vmatprep.subr.bf16.mxu0 %v4160_v16 }
 0x2a4   :  { %2501 = vmatpush3.bf16.msra.mxu1 %v4159_v60 }
 0x2a5   :  { %2503 = vmatprep.subr.bf16.mxu1 %v4161_v12  ;;  %2473 = vmatpush3.bf16.msra.mxu0 %v4162_v3 }
 0x2a6   :  { %2475 = vmatprep.subr.bf16.mxu0 %v4164_v18 }
 0x2a8   :  { %2505 = vmatpush3.bf16.msra.mxu1 %v4163_v61 }
 0x2a9   :  { %2507 = vmatprep.subr.bf16.mxu1 %v4165_v45  ;;  %2477 = vmatpush3.bf16.msra.mxu0 %v4166_v34 }
 0x2aa   :  { %2479 = vmatprep.subr.bf16.mxu0 %v4168_v15 }
 0x2ac   :  { %2509 = vmatpush3.bf16.msra.mxu1 %v4167_v56 }
 0x2ad   :  { %2511 = vmatprep.subr.bf16.mxu1 %v4169_v28  ;;  %2481 = vmatpush3.bf16.msra.mxu0 %v4170_v31  ;;  %v1239_v31 = vld [vmem:[%s4037_s2] sm:$0xff] }
 0x2ae   :  { %2483 = vmatprep.subr.bf16.mxu0 %v4172_v1  ;;  %v2868_v1 = vmov 2  }
 0x2af   :  { %2641 = vset.pattern.permute.xlu1 %v2868_v1 }
 0x2b0   :  { %2513 = vmatpush3.bf16.msra.mxu1 %v4171_v55  ;;  %v1241_v55 = vld [vmem:[%s4037_s2 + $0x10] sm:$0xff] }
 0x2b1   :  { %2515 = vmatprep.subr.bf16.mxu1 %v4173_v23  ;;  %2485 = vmatpush3.bf16.msra.mxu0 %v4174_v29  ;;  %v3707_v23 = vld [vmem:[%s4036_s1] sm:$0xff]  ;;  %v2869_v29 = vmov 3  }
 0x2b2   :  { %2487 = vmatprep.subr.bf16.mxu0 %v4176_v30  ;;  %1352 = vperm.xlu1 %2641, %v3707_v23  }
 0x2b3   :  { %2642 = vset.pattern.permute.xlu0 %v2869_v29 }
 0x2b4   :  { %2517 = vmatpush3.bf16.msra.mxu1 %v4175_v27  ;;  %1364 = vperm.xlu0 %2642, %v3707_v23   ;;  %v4184_v27 = vld [vmem:[#allocation40_spill] sm:$0xff] }
 0x2b5   :  { %2519 = vmatprep.subr.bf16.mxu1 %v4177_v59  ;;  %2489 = vmatpush3.bf16.msra.mxu0 %v4178_v54 }
 0x2b6   :  { %2491 = vmatprep.subr.bf16.mxu0 %v4180_v49  ;;  %1356 = vperm.xlu1 %2641, %v4184_v27  }
 0x2b8   :  { %2521 = vmatpush3.bf16.msra.mxu1 %v4179_v22 }
 0x2b9   :  { %2523 = vmatprep.subr.bf16.mxu1 %v4181_v11  ;;  %2493 = vmatpush3.bf16.msra.mxu0 %v4182_v17 }
 0x2ba   :  { %2643 = vset.pattern.permute.xlu1 %v2869_v29 }
 0x2bb   :  { %1368 = vperm.xlu1 %2643, %v4184_v27   ;;  %v1240_v27 = vld [vmem:[%s4037_s2 + $0x8] sm:$0xff] }
 0x2bc   :  { %2525 = vmatpush3.bf16.msra.mxu1 %v4183_v44 }
 0x36f   :  { %v1009_v13 = vpop.f32.mrb[8].mxu0 }
 0x370   :  { %v1011_v47 = vpop.f32.mrb[9].mxu0  ;;  %v3660_v26 = vadd.f32 %v1009_v13, %v947_v33 }
 0x371   :  { %v3656_v5 = vadd.f32 %v1011_v47, %v947_v33  ;;  %v1013_v48 = vpop.f32.mrb[10].mxu0 }
 0x372   :  { %v1052_v9 = vpop.f32.mrb[8].mxu1  ;;  %v1015_v43 = vpop.f32.mrb[11].mxu0  ;;  %v3674_v16 = vadd.f32 %v1013_v48, %v952_v39  ;;  %v1061_v18 = vmul.f32 %v3660_v26, %v3660_v26 }
 0x373   :  { %v1054_v46 = vpop.f32.mrb[9].mxu1  ;;  %v3662_v20 = vadd.f32 %v1052_v9, %v947_v33  ;;  %v3664_v32 = vadd.f32 %v1015_v43, %v952_v39  ;;  %1133 = vmatprep.mubr.f32.mxu0 %v3656_v5  ;;  %v1062_v3 = vmul.f32 %v3656_v5, %v3656_v5 }
 0x374   :  { %v3658_v8 = vadd.f32 %v1054_v46, %v947_v33  ;;  %v1056_v51 = vpop.f32.mrb[10].mxu1  ;;  %1134 = vmatmul.mubr.f32.vlgmr.msra.gmra.mrb[12].mxu0 %v3660_v26  ;;  %v1065_v15 = vmul.f32 %v3674_v16, %v3674_v16 }
 0x375   :  { %v1058_v52 = vpop.f32.mrb[11].mxu1  ;;  %1138 = vmatprep.mubr.f32.mxu0 %v3664_v32  ;;  %v3676_v12 = vadd.f32 %v1056_v51, %v952_v39  ;;  %v1063_v45 = vmul.f32 %v3662_v20, %v3662_v20  ;;  %v1066_v34 = vmul.f32 %v3664_v32, %v3664_v32 }
 0x376   :  { %v3666_v60 = vadd.f32 %v1058_v52, %v952_v39  ;;  %1218 = vmatprep.mubr.f32.mxu1 %v3658_v8  ;;  %v1064_v61 = vmul.f32 %v3658_v8, %v3658_v8 }
 0x377   :  { %1219 = vmatmul.mubr.f32.vlgmr.msra.gmra.mrb[12].mxu1 %v3662_v20  ;;  %v1067_v28 = vmul.f32 %v3676_v12, %v3676_v12 }
 0x378   :  { %1223 = vmatprep.mubr.f32.mxu1 %v3666_v60  ;;  %1139 = vmatmul.mubr.f32.gmra.mrb[14].mxu0 %v3674_v16  ;;  %v1068_v56 = vmul.f32 %v3666_v60, %v3666_v60 }
 0x379   :  { %1143 = vmatprep.mubr.f32.mxu0 %v1062_v3 }
 0x37b   :  { %1224 = vmatmul.mubr.f32.gmra.mrb[14].mxu1 %v3676_v12 }
 0x37c   :  { %1228 = vmatprep.mubr.f32.mxu1 %v1064_v61  ;;  %1144 = vmatmul.mubr.f32.gmra.mrb[16].mxu0 %v1061_v18 }
 0x37d   :  { %1148 = vmatprep.mubr.f32.mxu0 %v1066_v34 }
 0x37f   :  { %1229 = vmatmul.mubr.f32.gmra.mrb[16].mxu1 %v1063_v45 }
 0x380   :  { %1233 = vmatprep.mubr.f32.mxu1 %v1068_v56  ;;  %1149 = vmatmul.mubr.f32.gmra.mrb[18].mxu0 %v1065_v15 }
 0x381   :  { %2392 = vmatprep.mubr.msk.f32.mxu0 %vm1243_vm2, %v1239_v31 }
 0x383   :  { %1234 = vmatmul.mubr.f32.gmra.mrb[18].mxu1 %v1067_v28 }
 0x384   :  { %2395 = vmatprep.mubr.msk.f32.mxu1 %vm1243_vm2, %v1241_v55 }
 0x447   :  { %v2320_v30 = vpop.f32.mrb[12].mxu0 }
 0x448   :  { %v2321_v54 = vpop.f32.mrb[13].mxu0 }
 0x449   :  { %v2322_v49 = vadd.f32 %v2321_v54, %v2320_v30  ;;  %v1242_v30 = vld [vmem:[%s4037_s2 + $0x18] sm:$0xff]  ;;  %v4186_v54 = vld [vmem:[#allocation39_spill] sm:$0xff] }
 0x44a   :  { %v2364_v59 = vpop.f32.mrb[12].mxu1 }
 0x44b   :  { %v2365_v22 = vpop.f32.mrb[13].mxu1  ;;  %v2323_v44 = vpop.f32.mrb[14].mxu0 }
 0x44c   :  { %v2366_v11 = vadd.f32 %v2365_v22, %v2364_v59  ;;  %v2324_v39 = vpop.f32.mrb[15].mxu0  ;;  %v4185_v59 = vld [vmem:[#allocation38_spill] sm:$0xff]  ;;  %v4187_v22 = vld [vmem:[#allocation36_spill] sm:$0xff] }
 0x44d   :  { %v2325_v9 = vadd.f32 %v2324_v39, %v2323_v44 }
 0x44e   :  { %v1221_v17 = vadd.f32 %v2366_v11, %v2322_v49  ;;  %v2367_v33 = vpop.f32.mrb[14].mxu1  ;;  %v4188_v49 = vmov 0.0   ;;  %v4189_v11 = vld [vmem:[#allocation37_spill] sm:$0xff] }
 0x44f   :  { %v2368_v13 = vpop.f32.mrb[15].mxu1  ;;  %v2326_v48 = vpop.f32.mrb[16].mxu0 }
 0x450   :  { %v2369_v47 = vadd.f32 %v2368_v13, %v2367_v33  ;;  %v2327_v43 = vpop.f32.mrb[17].mxu0 }
 0x451   :  { %v2328_v61 = vadd.f32 %v2327_v43, %v2326_v48 }
 0x452   :  { %v1226_v46 = vadd.f32 %v2369_v47, %v2325_v9  ;;  %v2370_v51 = vpop.f32.mrb[16].mxu1 }
 0x453   :  { %v2371_v52 = vpop.f32.mrb[17].mxu1  ;;  %v2329_v34 = vpop.f32.mrb[18].mxu0 }
 0x454   :  { %v2526_v3 = vpack.c.bf16 %v1226_v46, %v1221_v17  ;;  %v2372_v18 = vadd.f32 %v2371_v52, %v2370_v51  ;;  %v2330_v15 = vpop.f32.mrb[19].mxu0 }
 0x455   :  { %v2331_v31 = vadd.f32 %v2330_v15, %v2329_v34 }
 0x456   :  { %v1231_v45 = vadd.f32 %v2372_v18, %v2328_v61  ;;  %v2373_v56 = vpop.f32.mrb[18].mxu1  ;;  %2527 = vmatprep.subr.bf16.mxu0 %v2526_v3  ;;  %2534 = vmatprep.subr.bf16.mxu1 %v2526_v3 }
 0x457   :  { %v2374_v28 = vpop.f32.mrb[19].mxu1  ;;  %2529 = vmatpush3.bf16.msra.mxu0 %v2526_v3  ;;  %2536 = vmatpush3.bf16.msra.mxu1 %v2526_v3  ;;  %v1353_v3 = vpop.permute.xlu1 %1352 }
 0x458   :  { %v2375_v55 = vadd.f32 %v2374_v28, %v2373_v56 }
 0x45a   :  { %v1236_v1 = vadd.f32 %v2375_v55, %v2331_v31  ;;  %v1365_v31 = vpop.permute.xlu0 %1364 }
 0x45b   :  { %v1357_v61 = vpop.permute.xlu1 %1356 }
 0x45c   :  { %v2530_v29 = vpack.c.bf16 %v1236_v1, %v1231_v45 }
 0x45e   :  { %2531 = vmatprep.subr.bf16.mxu0 %v2530_v29  ;;  %2535 = vmatprep.subr.bf16.mxu1 %v2530_v29 }
 0x45f   :  { %2533 = vmatpush3.bf16.msra.mxu0 %v2530_v29  ;;  %2537 = vmatpush3.bf16.msra.mxu1 %v2530_v29  ;;  %v1369_v1 = vpop.permute.xlu1 %1368 }
 0x460   :  { %2192 = vmatprep.subr.msk.mxu1 %vm305_vm0, %v4185_v59  ;;  %2198 = vmatprep.subr.msk.mxu0 %vm305_vm0, %v4186_v54 }
 0x462   :  { %2393 = vmatmul.mubr.msk.f32.vlgmr.msra.gmra.mrb[20].mxu0 %vm1243_vm2, %v1240_v27  ;;  %2396 = vmatmul.mubr.msk.f32.vlgmr.msra.gmra.mrb[20].mxu1 %vm1243_vm2, %v1242_v30 }
 0x463   :  { %2193 = vmatpush1.msk.msra.mxu1 %vm305_vm0, %v4187_v22  ;;  %1449 = vmatprep.mubr.f32.mxu1 %v4188_v49 }
 0x464   :  { %2199 = vmatpush1.msk.msra.mxu0 %vm305_vm0, %v4189_v11  ;;  %1538 = vmatprep.mubr.f32.mxu0 %v4188_v49 }
 0x535   :  { %v2394_v17 = vpop.f32.mrb[20].mxu0  ;;  %v2397_v44 = vpop.f32.mrb[20].mxu1 }
 0x536   :  { %v1342_v33 = vmul.f32 %v2394_v17, %v2394_v17  ;;  %v1322_v39 = vpop.f32.mrb[21].mxu0  ;;  %v1332_v13 = vpop.f32.mrb[21].mxu1 }
 0x537   :  { %v1341_v9 = vmul.f32 %v1322_v39, %v1322_v39 }
 0x538   :  { %v1344_v47 = vsub.f32 %v2397_v44, %v1342_v33 }
 0x539   :  { %v1343_v46 = vsub.f32 %v1332_v13, %v1341_v9 }
 0x53a   :  { %v1346_v48 = vmax.f32 %v1344_v47, 0.0 }
 0x53b   :  { %v1345_v51 = vmax.f32 %v1343_v46, 0.0 }
 0x53c   :  { %v1348_v43 = vadd.f32 1e-05, %v1346_v48 }
 0x53d   :  { %v1347_v52 = vadd.f32 1e-05, %v1345_v51 }
 0x53e   :  { %2821 = vrsqrt.f32 %v1348_v43 }
 0x53f   :  { %2823 = vrsqrt.f32 %v1347_v52 }
 0x548   :  { %v2822_v18 = vpop.eup %2821 }
 0x549   :  { %v2824_v45 = vpop.eup %2823  ;;  %v1360_v34 = vmul.f32 %v2822_v18, %v1357_v61 }
 0x54a   :  { %v1359_v56 = vmul.f32 %v2824_v45, %v1353_v3 }
 0x54b   :  { %v1362_v15 = vmul.f32 %v2394_v17, %v1360_v34 }
 0x54c   :  { %2194 = vmatmul.mubr.msk.f32.vlgmr.msra.gmra.mrb[22].mxu1 %vm298_vm1, %v1359_v56  ;;  %2200 = vmatmul.mubr.msk.f32.vlgmr.msra.gmra.mrb[22].mxu0 %vm298_vm1, %v1359_v56  ;;  %v1361_v28 = vmul.f32 %v1359_v56, %v1322_v39 }
 0x54d   :  { %1455 = vmatprep.mubr.f32.mxu1 %v4188_v49  ;;  %1544 = vmatprep.mubr.f32.mxu0 %v4188_v49  ;;  %v1372_v29 = vsub.f32 %v1369_v1, %v1362_v15 }
 0x54e   :  { %v1371_v55 = vsub.f32 %v1365_v31, %v1361_v28 }
 0x550   :  { %2195 = vmatmul.mubr.msk.f32.gmra.mrb[24].mxu1 %vm298_vm1, %v1360_v34  ;;  %2201 = vmatmul.mubr.msk.f32.gmra.mrb[24].mxu0 %vm298_vm1, %v1360_v34 }
 0x551   :  { %1461 = vmatprep.mubr.f32.mxu1 %v4188_v49  ;;  %1550 = vmatprep.mubr.f32.mxu0 %v4188_v49 }
 0x554   :  { %2196 = vmatmul.mubr.msk.f32.gmra.mrb[26].mxu1 %vm298_vm1, %v1371_v55  ;;  %2202 = vmatmul.mubr.msk.f32.gmra.mrb[26].mxu0 %vm298_vm1, %v1371_v55 }
 0x555   :  { %1467 = vmatprep.mubr.f32.mxu1 %v4188_v49  ;;  %1556 = vmatprep.mubr.f32.mxu0 %v4188_v49 }
 0x558   :  { %2197 = vmatmul.mubr.msk.f32.gmra.mrb[28].mxu1 %vm298_vm1, %v1372_v29  ;;  %2203 = vmatmul.mubr.msk.f32.gmra.mrb[28].mxu0 %vm298_vm1, %v1372_v29 }
 0x61f   :  { %v1451_v27 = vpop.f32.mrb[22].mxu1  ;;  %v1540_v30 = vpop.f32.mrb[22].mxu0 }
 0x620   :  { %v1453_v59 = vpop.f32.mrb[23].mxu1  ;;  %v1542_v54 = vpop.f32.mrb[23].mxu0  ;;  %v1563_v33 = vmul.f32 %v1451_v27, %v3660_v26  ;;  %v1565_v39 = vmul.f32 %v1540_v30, %v3662_v20 }
 0x621   :  { %v1564_v13 = vmul.f32 %v1453_v59, %v3656_v5  ;;  %v1566_v9 = vmul.f32 %v1542_v54, %v3658_v8 }
 0x623   :  { %v1457_v22 = vpop.f32.mrb[24].mxu1  ;;  %v1546_v11 = vpop.f32.mrb[24].mxu0 }
 0x624   :  { %v1459_v17 = vpop.f32.mrb[25].mxu1  ;;  %v1548_v44 = vpop.f32.mrb[25].mxu0  ;;  %v1567_v34 = vmul.f32 %v1457_v22, %v3674_v16  ;;  %v1569_v26 = vmul.f32 %v1546_v11, %v3676_v12 }
 0x625   :  { %v1568_v5 = vmul.f32 %v1459_v17, %v3664_v32  ;;  %v1570_v8 = vmul.f32 %v1548_v44, %v3666_v60 }
 0x627   :  { %v1463_v47 = vpop.f32.mrb[26].mxu1  ;;  %v1552_v46 = vpop.f32.mrb[26].mxu0 }
 0x628   :  { %v1571_v48 = vadd.f32 %v1563_v33, %v1463_v47  ;;  %v1573_v51 = vadd.f32 %v1565_v39, %v1552_v46  ;;  %v1465_v43 = vpop.f32.mrb[27].mxu1  ;;  %v1554_v52 = vpop.f32.mrb[27].mxu0 }
 0x629   :  { %v1572_v3 = vadd.f32 %v1564_v13, %v1465_v43  ;;  %v1574_v61 = vadd.f32 %v1566_v9, %v1554_v52 }
 0x62a   :  { %v1587_v18 = vmul.f32 0.2, %v1571_v48  ;;  %v1589_v45 = vmul.f32 0.2, %v1573_v51  ;;  %vm1579_vm0 = vcmp.gt.f32.partialorder %v1571_v48, 0.0  ;;  %vm1581_vm1 = vcmp.gt.f32.partialorder %v1573_v51, 0.0 }
 0x62b   :  { %vm1580_vm3 = vcmp.gt.f32.partialorder %v1572_v3, 0.0  ;;  %v1588_v20 = vmul.f32 0.2, %v1572_v3  ;;  %v1469_v56 = vpop.f32.mrb[28].mxu1  ;;  %v1558_v15 = vpop.f32.mrb[28].mxu0  ;;  %vm1582_vm4 = vcmp.gt.f32.partialorder %v1574_v61, 0.0 }
 0x62c   :  { %v1590_v28 = vmul.f32 0.2, %v1574_v61  ;;  %v1575_v31 = vadd.f32 %v1567_v34, %v1469_v56  ;;  %v1577_v55 = vadd.f32 %v1569_v26, %v1558_v15  ;;  %v1471_v1 = vpop.f32.mrb[29].mxu1  ;;  %v1560_v29 = vpop.f32.mrb[29].mxu0  ;;  %v3753_v27 = vsel %vm1579_vm0, %v1571_v48, %v1587_v18  ;;  %v2826_v18 = vld [vmem:[%s4036_s1 + $0x8] sm:$0xff] }
 0x62d   :  { %v3755_v16 = vsel %vm1581_vm1, %v1573_v51, %v1589_v45  ;;  %v1576_v12 = vadd.f32 %v1568_v5, %v1471_v1  ;;  %v1578_v30 = vadd.f32 %v1570_v8, %v1560_v29  ;;  %v3758_v22 = vsel %vm1580_vm3, %v1572_v3, %v1588_v20  ;;  %v2818_v3 = vld [vmem:[%s4042_s7 + $0x4] ss:$8 sps:$4 sm:$0xff]  }
 0x62e   :  { %vm1583_vm5 = vcmp.gt.f32.partialorder %v1575_v31, 0.0  ;;  %v1591_v32 = vmul.f32 0.2, %v1575_v31  ;;  %vm1585_vm11 = vcmp.gt.f32.partialorder %v1577_v55, 0.0  ;;  %v1593_v60 = vmul.f32 0.2, %v1577_v55 }
 0x62f   :  { %vm1584_vm15 = vcmp.gt.f32.partialorder %v1576_v12, 0.0  ;;  %v1592_v59 = vmul.f32 0.2, %v1576_v12  ;;  %vm1586_vm2 = vcmp.gt.f32.partialorder %v1578_v30, 0.0  ;;  %v1594_v54 = vmul.f32 0.2, %v1578_v30 }
 0x630   :  { %v3761_v11 = vsel %vm1582_vm4, %v1574_v61, %v1590_v28  ;;  %v3763_v17 = vsel %vm1583_vm5, %v1575_v31, %v1591_v32  ;;  %v3765_v44 = vsel %vm1585_vm11, %v1577_v55, %v1593_v60  ;;  %vm1874_vm0 = vcmask 130048  }
 0x631   :  { %v3767_v33 = vsel %vm1584_vm15, %v1576_v12, %v1592_v59  ;;  %v3769_v39 = vsel %vm1586_vm2, %v1578_v30, %v1594_v54  ;;  %v2644_v13 = vpack.i.bf16 %v3763_v17, %v3753_v27  ;;  %v2649_v9 = vpack.i.bf16 %v3765_v44, %v3755_v16  ;;  %2206 = vmatprep.mubr.msk.bf16.mxu1 %vm1874_vm0, %v2818_v3 }
 0x632   :  { %v2724_v47 = vpack.i.bf16 %v3767_v33, %v3758_v22  ;;  %v2729_v46 = vpack.i.bf16 %v3769_v39, %v3761_v11  ;;  %v1732_v48 = vpack.c.bf16 %v3767_v33, %v3758_v22  ;;  %v1734_v51 = vpack.c.bf16 %v3769_v39, %v3761_v11  ;;  %2207 = vmatprep.mubr.msk.bf16.mxu0 %vm1874_vm0, %v2818_v3 }
 0x633   :  { %2645 = vrot.lane.b32.xlu1 %v2644_v13, %s2859_s4  ;;  %v1731_v43 = vpack.c.bf16 %v3763_v17, %v3753_v27  ;;  %v1733_v52 = vpack.c.bf16 %v3765_v44, %v3755_v16  ;;  %v2870_v61 = vmov 5  }
 0x634   :  { %2725 = vrot.lane.b32.xlu0 %v2724_v47, %s2859_s4  ;;  %2804 = vset.pattern.permute.xlu1 %v2870_v61 }
 0x635   :  { %2805 = vset.pattern.permute.xlu0 %v2870_v61 }
 0x637   :  { %2650 = vrot.lane.b32.xlu1 %v2649_v9, %s2859_s4 }
 0x638   :  { %2730 = vrot.lane.b32.xlu0 %v2729_v46, %s2859_s4 }
 0x63b   :  { %2655 = vrot.lane.b32.xlu1 %v2644_v13, %s2860_s22 }
 0x63c   :  { %2735 = vrot.lane.b32.xlu0 %v2724_v47, %s2860_s22 }
 0x63f   :  { %2660 = vrot.lane.b32.xlu1 %v2649_v9, %s2860_s22 }
 0x640   :  { %2740 = vrot.lane.b32.xlu0 %v2729_v46, %s2860_s22 }
 0x643   :  { %2665 = vrot.lane.b32.xlu1 %v2644_v13, %s2862_s24 }
 0x644   :  { %2745 = vrot.lane.b32.xlu0 %v2724_v47, %s2862_s24 }
 0x647   :  { %2670 = vrot.lane.b32.xlu1 %v2649_v9, %s2862_s24 }
 0x648   :  { %2750 = vrot.lane.b32.xlu0 %v2729_v46, %s2862_s24 }
 0x64b   :  { %2675 = vrot.lane.b32.xlu1 %v2644_v13, %s2861_s23 }
 0x64c   :  { %2755 = vrot.lane.b32.xlu0 %v2724_v47, %s2861_s23 }
 0x64f   :  { %2680 = vrot.lane.b32.xlu1 %v2649_v9, %s2861_s23 }
 0x650   :  { %2760 = vrot.lane.b32.xlu0 %v2729_v46, %s2861_s23 }
 0x653   :  { %2685 = vrot.lane.b32.xlu1 %v2644_v13, %s2863_s25 }
 0x654   :  { %2765 = vrot.lane.b32.xlu0 %v2724_v47, %s2863_s25 }
 0x657   :  { %2690 = vrot.lane.b32.xlu1 %v2649_v9, %s2863_s25 }
 0x658   :  { %2770 = vrot.lane.b32.xlu0 %v2729_v46, %s2863_s25 }
 0x65b   :  { %2695 = vrot.lane.b32.xlu1 %v2644_v13, %s2865_s27 }
 0x65c   :  { %2775 = vrot.lane.b32.xlu0 %v2724_v47, %s2865_s27 }
 0x65f   :  { %2700 = vrot.lane.b32.xlu1 %v2649_v9, %s2865_s27 }
 0x660   :  { %2780 = vrot.lane.b32.xlu0 %v2729_v46, %s2865_s27 }
 0x663   :  { %2705 = vrot.lane.b32.xlu1 %v2644_v13, %s2864_s26 }
 0x664   :  { %2785 = vrot.lane.b32.xlu0 %v2724_v47, %s2864_s26 }
 0x667   :  { %2710 = vrot.lane.b32.xlu1 %v2649_v9, %s2864_s26 }
 0x668   :  { %2790 = vrot.lane.b32.xlu0 %v2729_v46, %s2864_s26 }
 0x66b   :  { %2715 = vrot.lane.b32.xlu1 %v2644_v13, %s2866_s28 }
 0x66c   :  { %2795 = vrot.lane.b32.xlu0 %v2724_v47, %s2866_s28 }
 0x66f   :  { %2720 = vrot.lane.b32.xlu1 %v2649_v9, %s2866_s28 }
 0x670   :  { %2800 = vrot.lane.b32.xlu0 %v2729_v46, %s2866_s28 }
 0x673   :  { %2128 = vperm.xlu1 %2804, %v3707_v23  }
 0x674   :  { %2132 = vperm.xlu0 %2805, %v2826_v18  }
 0x6a5   :  { %v2646_v45 = vpop.permute.xlu1 %2645 }
 0x6a6   :  { %v2648_v34 = vunpack.i.h.bf16 %v2646_v45  ;;  %v2647_v26 = vunpack.i.l.bf16 %v2646_v45  ;;  %v2726_v5 = vpop.permute.xlu0 %2725 }
 0x6a7   :  { %v2728_v8 = vunpack.i.h.bf16 %v2726_v5  ;;  %v2727_v20 = vunpack.i.l.bf16 %v2726_v5 }
 0x6a9   :  { %v1624_v56 = vsel %vm498_vm6, %v2648_v34, %v2728_v8  ;;  %v1623_v15 = vsel %vm498_vm6, %v2647_v26, %v2727_v20  ;;  %v2651_v28 = vpop.permute.xlu1 %2650 }
 0x6aa   :  { %v2653_v31 = vunpack.i.h.bf16 %v2651_v28  ;;  %v2652_v23 = vunpack.i.l.bf16 %v2651_v28  ;;  %v2731_v55 = vpop.permute.xlu0 %2730  ;;  %v1628_v1 = vpack.c.bf16 %v1624_v56, %v1623_v15 }
 0x6ab   :  { %v2733_v29 = vunpack.i.h.bf16 %v2731_v55  ;;  %v2732_v12 = vunpack.i.l.bf16 %v2731_v55 }
 0x6ac   :  { %v1621_v30 = vsel %vm498_vm6, %v2727_v20, %v2652_v23  ;;  %v1622_v32 = vsel %vm498_vm6, %v2728_v8, %v2653_v31  ;;  %v1632_v60 = vmul.bf16 %v1628_v1, %v3354_v7  ;;  %v4190_v20 = vld [vmem:[#allocation41_spill] sm:$0xff] }
 0x6ad   :  { %v1629_v59 = vpack.c.bf16 %v1622_v32, %v1621_v30  ;;  %v1620_v54 = vsel %vm498_vm6, %v2653_v31, %v2733_v29  ;;  %v1626_v13 = vsel %vm498_vm6, %v2733_v29, %v2648_v34  ;;  %v1619_v9 = vsel %vm498_vm6, %v2652_v23, %v2732_v12  ;;  %v2656_v47 = vpop.permute.xlu1 %2655 }
 0x6ae   :  { %v1625_v46 = vsel %vm498_vm6, %v2732_v12, %v2647_v26  ;;  %v2658_v3 = vunpack.i.h.bf16 %v2656_v47  ;;  %v2657_v61 = vunpack.i.l.bf16 %v2656_v47  ;;  %v2736_v18 = vpop.permute.xlu0 %2735  ;;  %1878 = vmatprep.subr.bf16.mxu1 %v1632_v60  ;;  %v1630_v45 = vpack.c.bf16 %v1620_v54, %v1619_v9  ;;  %v4191_v54 = vld [vmem:[#allocation42_spill] sm:$0xff] }
 0x6af   :  { %v1627_v7 = vpack.c.bf16 %v1626_v13, %v1625_v46  ;;  %v2738_v5 = vunpack.i.h.bf16 %v2736_v18  ;;  %v2737_v8 = vunpack.i.l.bf16 %v2736_v18  ;;  %v1633_v26 = vmul.bf16 %v1629_v59, %v3363_v0 }
 0x6b0   :  { %v1634_v56 = vmul.bf16 %v1630_v45, %v4190_v20  ;;  %vm1966_vm6 = vcmask 64512  }
 0x6b1   :  { %v1656_v34 = vsel %vm557_vm7, %v2658_v3, %v2738_v5  ;;  %v1655_v15 = vsel %vm557_vm7, %v2657_v61, %v2737_v8  ;;  %v2661_v28 = vpop.permute.xlu1 %2660  ;;  %v1631_v31 = vmul.bf16 %v1627_v7, %v3366_v4 }
 0x6b2   :  { %v2663_v23 = vunpack.i.h.bf16 %v2661_v28  ;;  %v2662_v55 = vunpack.i.l.bf16 %v2661_v28  ;;  %v2741_v1 = vpop.permute.xlu0 %2740  ;;  %1921 = vmatprep.subr.bf16.mxu0 %v1634_v56  ;;  %v1660_v29 = vpack.c.bf16 %v1656_v34, %v1655_v15  ;;  %v4192_v34 = vld [vmem:[#allocation43_spill] sm:$0xff] }
 0x6b3   :  { %v2743_v12 = vunpack.i.h.bf16 %v2741_v1  ;;  %v2742_v30 = vunpack.i.l.bf16 %v2741_v1  ;;  %1879 = vmatpush1.bf16.msra.mxu1 %v1631_v31  ;;  %1922 = vmatpush1.bf16.msra.mxu0 %v1633_v26 }
 0x6b4   :  { %v1653_v32 = vsel %vm557_vm7, %v2737_v8, %v2662_v55  ;;  %v1654_v60 = vsel %vm557_vm7, %v2738_v5, %v2663_v23  ;;  %v1664_v13 = vmul.bf16 %v1660_v29, %v4191_v54 }
 0x6b5   :  { %v1661_v4 = vpack.c.bf16 %v1654_v60, %v1653_v32  ;;  %v1652_v0 = vsel %vm557_vm7, %v2663_v23, %v2743_v12  ;;  %v1658_v59 = vsel %vm557_vm7, %v2743_v12, %v2658_v3  ;;  %v1651_v9 = vsel %vm557_vm7, %v2662_v55, %v2742_v30  ;;  %v2666_v47 = vpop.permute.xlu1 %2665 }
 0x6b6   :  { %v1657_v46 = vsel %vm557_vm7, %v2742_v30, %v2657_v61  ;;  %v2668_v18 = vunpack.i.h.bf16 %v2666_v47  ;;  %v2667_v45 = vunpack.i.l.bf16 %v2666_v47  ;;  %v2746_v7 = vpop.permute.xlu0 %2745  ;;  %1880 = vmatprep.subr.bf16.mxu1 %v1664_v13  ;;  %v1662_v5 = vpack.c.bf16 %v1652_v0, %v1651_v9  ;;  %v4193_v61 = vld [vmem:[#allocation46_spill] sm:$0xff] }
 0x6b7   :  { %v1659_v8 = vpack.c.bf16 %v1658_v59, %v1657_v46  ;;  %v2748_v20 = vunpack.i.h.bf16 %v2746_v7  ;;  %v2747_v56 = vunpack.i.l.bf16 %v2746_v7  ;;  %v1665_v23 = vmul.bf16 %v1661_v4, %v4193_v61 }
 0x6b8   :  { %v1666_v15 = vmul.bf16 %v1662_v5, %v4192_v34  ;;  %v4194_v34 = vld [vmem:[#allocation45_spill] sm:$0xff] }
 0x6b9   :  { %v1688_v3 = vsel %vm606_vm9, %v2668_v18, %v2748_v20  ;;  %v1687_v28 = vsel %vm606_vm9, %v2667_v45, %v2747_v56  ;;  %v2671_v31 = vpop.permute.xlu1 %2670  ;;  %v1663_v26 = vmul.bf16 %v1659_v8, %v3376_v6 }
 0x6ba   :  { %v2673_v55 = vunpack.i.h.bf16 %v2671_v31  ;;  %v2672_v1 = vunpack.i.l.bf16 %v2671_v31  ;;  %v2751_v29 = vpop.permute.xlu0 %2750  ;;  %1923 = vmatprep.subr.bf16.mxu0 %v1666_v15  ;;  %v1692_v12 = vpack.c.bf16 %v1688_v3, %v1687_v28 }
 0x6bb   :  { %v2753_v30 = vunpack.i.h.bf16 %v2751_v29  ;;  %v2752_v32 = vunpack.i.l.bf16 %v2751_v29  ;;  %1881 = vmatpush1.bf16.msra.mxu1 %v1663_v26  ;;  %1924 = vmatpush1.bf16.msra.mxu0 %v1665_v23 }
 0x6bc   :  { %v1685_v60 = vsel %vm606_vm9, %v2747_v56, %v2672_v1  ;;  %v1686_v54 = vsel %vm606_vm9, %v2748_v20, %v2673_v55  ;;  %v1696_v13 = vmul.bf16 %v1692_v12, %v3392_v42 }
 0x6bd   :  { %v1693_v6 = vpack.c.bf16 %v1686_v54, %v1685_v60  ;;  %v1684_v4 = vsel %vm606_vm9, %v2673_v55, %v2753_v30  ;;  %v1690_v0 = vsel %vm606_vm9, %v2753_v30, %v2668_v18  ;;  %v1683_v59 = vsel %vm606_vm9, %v2672_v1, %v2752_v32  ;;  %v2676_v9 = vpop.permute.xlu1 %2675 }
 0x6be   :  { %v1689_v47 = vsel %vm606_vm9, %v2752_v32, %v2667_v45  ;;  %v2678_v46 = vunpack.i.h.bf16 %v2676_v9  ;;  %v2677_v7 = vunpack.i.l.bf16 %v2676_v9  ;;  %v2756_v5 = vpop.permute.xlu0 %2755  ;;  %1882 = vmatprep.subr.bf16.mxu1 %v1696_v13  ;;  %v1694_v8 = vpack.c.bf16 %v1684_v4, %v1683_v59  ;;  %v4195_v32 = vld [vmem:[#allocation47_spill] sm:$0xff] }
 0x6bf   :  { %v1691_v42 = vpack.c.bf16 %v1690_v0, %v1689_v47  ;;  %v2758_v20 = vunpack.i.h.bf16 %v2756_v5  ;;  %v2757_v56 = vunpack.i.l.bf16 %v2756_v5  ;;  %v1697_v45 = vmul.bf16 %v1693_v6, %v3394_v21 }
 0x6c0   :  { %v1698_v15 = vmul.bf16 %v1694_v8, %v4194_v34 }
 0x6c1   :  { %v1720_v18 = vsel %vm643_vm8, %v2678_v46, %v2758_v20  ;;  %v1719_v3 = vsel %vm643_vm8, %v2677_v7, %v2757_v56  ;;  %v2681_v28 = vpop.permute.xlu1 %2680  ;;  %v1695_v31 = vmul.bf16 %v1691_v42, %v3400_v38 }
 0x6c2   :  { %v2683_v26 = vunpack.i.h.bf16 %v2681_v28  ;;  %v2682_v61 = vunpack.i.l.bf16 %v2681_v28  ;;  %v2761_v23 = vpop.permute.xlu0 %2760  ;;  %1925 = vmatprep.subr.bf16.mxu0 %v1698_v15  ;;  %v1724_v55 = vpack.c.bf16 %v1720_v18, %v1719_v3 }
 0x6c3   :  { %v2763_v1 = vunpack.i.h.bf16 %v2761_v23  ;;  %v2762_v29 = vunpack.i.l.bf16 %v2761_v23  ;;  %1883 = vmatpush1.bf16.msra.mxu1 %v1695_v31  ;;  %1926 = vmatpush1.bf16.msra.mxu0 %v1697_v45 }
 0x6c4   :  { %v1717_v12 = vsel %vm643_vm8, %v2757_v56, %v2682_v61  ;;  %v1718_v30 = vsel %vm643_vm8, %v2758_v20, %v2683_v26  ;;  %v1728_v60 = vmul.bf16 %v1724_v55, %v4195_v32  ;;  %v4196_v20 = vld [vmem:[#allocation44_spill] sm:$0xff] }
 0x6c5   :  { %v1725_v38 = vpack.c.bf16 %v1718_v30, %v1717_v12  ;;  %v1716_v21 = vsel %vm643_vm8, %v2683_v26, %v2763_v1  ;;  %v1722_v54 = vsel %vm643_vm8, %v2763_v1, %v2678_v46  ;;  %v1715_v13 = vsel %vm643_vm8, %v2682_v61, %v2762_v29  ;;  %v2686_v6 = vpop.permute.xlu1 %2685 }
 0x6c6   :  { %v1721_v4 = vsel %vm643_vm8, %v2762_v29, %v2677_v7  ;;  %v2688_v0 = vunpack.i.h.bf16 %v2686_v6  ;;  %v2687_v59 = vunpack.i.l.bf16 %v2686_v6  ;;  %v2766_v9 = vpop.permute.xlu0 %2765  ;;  %1884 = vmatprep.subr.bf16.mxu1 %v1728_v60  ;;  %v1726_v47 = vpack.c.bf16 %v1716_v21, %v1715_v13  ;;  %v4197_v7 = vld [vmem:[#allocation48_spill] sm:$0xff]  ;;  %v4198_v21 = vld [vmem:[#allocation49_spill] sm:$0xff] }
 0x6c7   :  { %v1723_v5 = vpack.c.bf16 %v1722_v54, %v1721_v4  ;;  %v2768_v8 = vunpack.i.h.bf16 %v2766_v9  ;;  %v2767_v42 = vunpack.i.l.bf16 %v2766_v9  ;;  %v1729_v3 = vmul.bf16 %v1725_v38, %v4197_v7 }
 0x6c8   :  { %v1730_v56 = vmul.bf16 %v1726_v47, %v4196_v20 }
 0x6c9   :  { %v1756_v46 = vsel %vm684_vm10, %v2688_v0, %v2768_v8  ;;  %v1755_v34 = vsel %vm684_vm10, %v2687_v59, %v2767_v42  ;;  %v2691_v15 = vpop.permute.xlu1 %2690  ;;  %v1727_v18 = vmul.bf16 %v1723_v5, %v3396_v41 }
 0x6ca   :  { %v2693_v28 = vunpack.i.h.bf16 %v2691_v15  ;;  %v2692_v31 = vunpack.i.l.bf16 %v2691_v15  ;;  %v2771_v45 = vpop.permute.xlu0 %2770  ;;  %1927 = vmatprep.subr.bf16.mxu0 %v1730_v56  ;;  %v1759_v23 = vpack.c.bf16 %v1756_v46, %v1755_v34 }
 0x6cb   :  { %v2773_v26 = vunpack.i.h.bf16 %v2771_v45  ;;  %v2772_v61 = vunpack.i.l.bf16 %v2771_v45  ;;  %1885 = vmatpush1.bf16.msra.mxu1 %v1727_v18  ;;  %1928 = vmatpush1.bf16.msra.mxu0 %v1729_v3 }
 0x6cc   :  { %v1753_v55 = vsel %vm684_vm10, %v2767_v42, %v2692_v31  ;;  %v1754_v1 = vsel %vm684_vm10, %v2768_v8, %v2693_v28  ;;  %1886 = vmatprep.subr.bf16.mxu1 %v1732_v48  ;;  %1929 = vmatprep.subr.bf16.mxu0 %v1734_v51 }
 0x6cd   :  { %v1752_v41 = vsel %vm684_vm10, %v2693_v28, %v2773_v26  ;;  %v1758_v29 = vsel %vm684_vm10, %v2773_v26, %v2688_v0  ;;  %v1751_v12 = vsel %vm684_vm10, %v2692_v31, %v2772_v61  ;;  %v1757_v30 = vsel %vm684_vm10, %v2772_v61, %v2687_v59  ;;  %v2696_v32 = vpop.permute.xlu1 %2695 }
 0x6ce   :  { %v1761_v60 = vpack.c.bf16 %v1752_v41, %v1751_v12  ;;  %v2698_v22 = vunpack.i.h.bf16 %v2696_v32  ;;  %v2697_v33 = vunpack.i.l.bf16 %v2696_v32  ;;  %v2776_v48 = vpop.permute.xlu0 %2775  ;;  %v1760_v38 = vpack.c.bf16 %v1754_v1, %v1753_v55 }
 0x6cf   :  { %v2778_v11 = vunpack.i.h.bf16 %v2776_v48  ;;  %v2777_v39 = vunpack.i.l.bf16 %v2776_v48  ;;  %1887 = vmatpush1.bf16.msra.mxu1 %v1731_v43  ;;  %1930 = vmatpush1.bf16.msra.mxu0 %v1733_v52  ;;  %v1762_v51 = vpack.c.bf16 %v1758_v29, %v1757_v30  ;;  %v1763_v59 = vmul.bf16 %v1759_v23, %v3406_v2 }
 0x6d0   :  { %v1764_v54 = vmul.bf16 %v1760_v38, %v4198_v21  ;;  %v1765_v13 = vmul.bf16 %v1761_v60, %v3398_v19 }
 0x6d1   :  { %v1788_v6 = vsel %vm721_vm13, %v2698_v22, %v2778_v11  ;;  %v1787_v4 = vsel %vm721_vm13, %v2697_v33, %v2777_v39  ;;  %v2701_v0 = vpop.permute.xlu1 %2700  ;;  %v1766_v27 = vmul.bf16 %v1762_v51, %v3404_v10 }
 0x6d2   :  { %v2703_v17 = vunpack.i.h.bf16 %v2701_v0  ;;  %v2702_v43 = vunpack.i.l.bf16 %v2701_v0  ;;  %1888 = vmatprep.subr.bf16.mxu1 %v1764_v54  ;;  %v2781_v16 = vpop.permute.xlu0 %2780  ;;  %v1791_v19 = vpack.c.bf16 %v1788_v6, %v1787_v4 }
 0x6d3   :  { %v2783_v44 = vunpack.i.h.bf16 %v2781_v16  ;;  %v2782_v52 = vunpack.i.l.bf16 %v2781_v16  ;;  %1889 = vmatpush1.bf16.msra.mxu1 %v1763_v59  ;;  %1931 = vmatprep.subr.bf16.mxu0 %v1766_v27 }
 0x6d4   :  { %v1785_v9 = vsel %vm721_vm13, %v2777_v39, %v2702_v43  ;;  %v1786_v47 = vsel %vm721_vm13, %v2778_v11, %v2703_v17  ;;  %1932 = vmatpush1.bf16.msra.mxu0 %v1765_v13  ;;  %v1795_v23 = vmul.bf16 %v1791_v19, %v3425_v36 }
 0x6d5   :  { %v1784_v2 = vsel %vm721_vm13, %v2703_v17, %v2783_v44  ;;  %v1790_v10 = vsel %vm721_vm13, %v2783_v44, %v2698_v22  ;;  %v1783_v5 = vsel %vm721_vm13, %v2702_v43, %v2782_v52  ;;  %v1789_v8 = vsel %vm721_vm13, %v2782_v52, %v2697_v33  ;;  %v2706_v42 = vpop.permute.xlu1 %2705 }
 0x6d6   :  { %v1793_v20 = vpack.c.bf16 %v1784_v2, %v1783_v5  ;;  %v2708_v56 = vunpack.i.h.bf16 %v2706_v42  ;;  %v2707_v46 = vunpack.i.l.bf16 %v2706_v42  ;;  %v2786_v34 = vpop.permute.xlu0 %2785  ;;  %v1792_v15 = vpack.c.bf16 %v1786_v47, %v1785_v9 }
 0x6d7   :  { %v2788_v18 = vunpack.i.h.bf16 %v2786_v34  ;;  %v2787_v7 = vunpack.i.l.bf16 %v2786_v34  ;;  %v1794_v3 = vpack.c.bf16 %v1790_v10, %v1789_v8 }
 0x6d8   :  { %v1796_v28 = vmul.bf16 %v1792_v15, %v3411_v57  ;;  %v1797_v31 = vmul.bf16 %v1793_v20, %v3415_v24  ;;  %v2816_v15 = vld [vmem:[%s4042_s7] ss:$8 sps:$4 sm:$0xff]  }
 0x6d9   :  { %v1820_v45 = vsel %vm758_vm12, %v2708_v56, %v2788_v18  ;;  %v1819_v26 = vsel %vm758_vm12, %v2707_v46, %v2787_v7  ;;  %v2711_v61 = vpop.permute.xlu1 %2710  ;;  %v1798_v55 = vmul.bf16 %v1794_v3, %v3417_v40 }
 0x6da   :  { %v2713_v1 = vunpack.i.h.bf16 %v2711_v61  ;;  %v2712_v41 = vunpack.i.l.bf16 %v2711_v61  ;;  %1890 = vmatprep.subr.bf16.mxu1 %v1796_v28  ;;  %v2791_v29 = vpop.permute.xlu0 %2790  ;;  %v1823_v57 = vpack.c.bf16 %v1820_v45, %v1819_v26 }
 0x6db   :  { %v2793_v12 = vunpack.i.h.bf16 %v2791_v29  ;;  %v2792_v30 = vunpack.i.l.bf16 %v2791_v29  ;;  %1891 = vmatpush1.bf16.msra.mxu1 %v1795_v23  ;;  %1933 = vmatprep.subr.bf16.mxu0 %v1798_v55 }
 0x6dc   :  { %v1817_v24 = vsel %vm758_vm12, %v2787_v7, %v2712_v41  ;;  %v1818_v32 = vsel %vm758_vm12, %v2788_v18, %v2713_v1  ;;  %1934 = vmatpush1.bf16.msra.mxu0 %v1797_v31  ;;  %v1827_v17 = vmul.bf16 %v1823_v57, %v3428_v63  ;;  %v1965_v18 = vld [vmem:[%s4043_s8 + $0x8] sm:$0xff] }
 0x6dd   :  { %v1816_v36 = vsel %vm758_vm12, %v2713_v1, %v2793_v12  ;;  %v1822_v40 = vsel %vm758_vm12, %v2793_v12, %v2708_v56  ;;  %v1815_v60 = vsel %vm758_vm12, %v2712_v41, %v2792_v30  ;;  %v1821_v22 = vsel %vm758_vm12, %v2792_v30, %v2707_v46  ;;  %v2716_v33 = vpop.permute.xlu1 %2715 }
 0x6de   :  { %v1825_v48 = vpack.c.bf16 %v1816_v36, %v1815_v60  ;;  %v2718_v38 = vunpack.i.h.bf16 %v2716_v33  ;;  %v2717_v11 = vunpack.i.l.bf16 %v2716_v33  ;;  %v2796_v39 = vpop.permute.xlu0 %2795  ;;  %v1824_v51 = vpack.c.bf16 %v1818_v32, %v1817_v24 }
 0x6df   :  { %v2798_v21 = vunpack.i.h.bf16 %v2796_v39  ;;  %v2797_v54 = vunpack.i.l.bf16 %v2796_v39  ;;  %v1826_v13 = vpack.c.bf16 %v1822_v40, %v1821_v22 }
 0x6e0   :  { %v1828_v6 = vmul.bf16 %v1824_v51, %v3413_v53  ;;  %v1829_v4 = vmul.bf16 %v1825_v48, %v3408_v50 }
 0x6e1   :  { %v1852_v0 = vsel %vm795_vm14, %v2718_v38, %v2798_v21  ;;  %v1851_v59 = vsel %vm795_vm14, %v2717_v11, %v2797_v54  ;;  %v2721_v27 = vpop.permute.xlu1 %2720  ;;  %v1830_v43 = vmul.bf16 %v1826_v13, %v3423_v14 }
 0x6e2   :  { %v2723_v16 = vunpack.i.h.bf16 %v2721_v27  ;;  %v2722_v44 = vunpack.i.l.bf16 %v2721_v27  ;;  %1892 = vmatprep.subr.bf16.mxu1 %v1828_v6  ;;  %v2801_v52 = vpop.permute.xlu0 %2800  ;;  %v1855_v53 = vpack.c.bf16 %v1852_v0, %v1851_v59 }
 0x6e3   :  { %v2803_v19 = vunpack.i.h.bf16 %v2801_v52  ;;  %v2802_v9 = vunpack.i.l.bf16 %v2801_v52  ;;  %1893 = vmatpush1.bf16.msra.mxu1 %v1827_v17  ;;  %1935 = vmatprep.subr.bf16.mxu0 %v1830_v43 }
 0x6e4   :  { %v1849_v50 = vsel %vm795_vm14, %v2797_v54, %v2722_v44  ;;  %v1850_v47 = vsel %vm795_vm14, %v2798_v21, %v2723_v16  ;;  %1936 = vmatpush1.bf16.msra.mxu0 %v1829_v4  ;;  %v1859_v34 = vmul.bf16 %v1855_v53, %v3441_v58  ;;  %v1964_v58 = vld [vmem:[%s4043_s8] sm:$0xff] }
 0x6e5   :  { %v1848_v63 = vsel %vm795_vm14, %v2723_v16, %v2803_v19  ;;  %v1854_v14 = vsel %vm795_vm14, %v2803_v19, %v2718_v38  ;;  %v1847_v2 = vsel %vm795_vm14, %v2722_v44, %v2802_v9  ;;  %v1853_v10 = vsel %vm795_vm14, %v2802_v9, %v2717_v11 }
 0x6e6   :  { %v1857_v5 = vpack.c.bf16 %v1848_v63, %v1847_v2  ;;  %v1856_v8 = vpack.c.bf16 %v1850_v47, %v1849_v50  ;;  %v1858_v42 = vpack.c.bf16 %v1854_v14, %v1853_v10 }
 0x6e8   :  { %v1860_v20 = vmul.bf16 %v1856_v8, %v3435_v62  ;;  %v1862_v56 = vmul.bf16 %v1858_v42, %v3438_v35  ;;  %v1861_v46 = vmul.bf16 %v1857_v5, %v3431_v25  ;;  %v2828_v62 = vld [vmem:[%s4035_s0 + $0x18] sm:$0xff]  ;;  %v2829_v25 = vld [vmem:[%s4035_s0] sm:$0xff]  ;;  %v2830_v35 = vld [vmem:[%s4035_s0 + $0x10] sm:$0xff]  ;;  %s2871_s0 = smov [#allocation2]  }
 0x6e9   :  { %s2156_s8 = sshll.u32 %s2871_s0, 4  ;;  %s2157_s8 = int_to_ptr.vmem [resolvable:$true] %s2156_s8 }
 0x6ea   :  { %1894 = vmatprep.subr.bf16.mxu1 %v1860_v20  ;;  %1937 = vmatprep.subr.bf16.mxu0 %v1862_v56  ;;  %s2831_s6 = scalar_lea.vmem %s2157_s8, 1024  ;;  %p2836_p1 = scmp.lt.s32.totalorder %s2157_s8, %s2157_s8 }
 0x6eb   :  { %1895 = vmatpush1.bf16.msra.mxu1 %v1859_v34  ;;  %1938 = vmatpush1.bf16.msra.mxu0 %v1861_v46  ;;  %p2832_p0 = scmp.ne.s32.totalorder %s2157_s8, %s2831_s6  ;;  %p2837_p2 = scmp.lt.s32.totalorder %s2831_s6, %s2831_s6 }
 0x6ec   :  { %1973 = vmatprep.subr.mxu1 %v2827_v37  ;;  %2050 = vmatprep.subr.mxu0 %v2828_v62 }
 0x6ed   :  { %p2838_p3 = por %p2837_p2, %p2836_p1 }
 0x6ee   :  { %1911 = vmatmul.mubr.bf16.vlgmr.msra.gmra.mrb[32].mxu1 %v2816_v15  ;;  %1954 = vmatmul.mubr.bf16.vlgmr.msra.gmra.mrb[32].mxu0 %v2816_v15 }
 0x6ef   :  { %1974 = vmatpush1.msra.mxu1 %v2829_v25  ;;  %2051 = vmatpush1.msra.mxu0 %v2830_v35  ;;  %p2839_p4 = pnand %p2838_p3, %p2832_p0 }
 0x6f0   :  { %2037 = vmatprep.mubr.f32.mxu1 %v4188_v49  ;;  %2114 = vmatprep.mubr.f32.mxu0 %v4188_v49 }
 0x6f2   :  { %v2129_v55 = vpop.permute.xlu1 %2128 }
 0x6f3   :  { %v2133_v40 = vpop.permute.xlu0 %2132 }
 0x6f6   :  { %2208 = vmatmul.mubr.msk.f32.vlgmr.msra.gmra.mrb[30].mxu1 %vm1966_vm6, %v1964_v58  ;;  %2210 = vmatmul.mubr.msk.f32.vlgmr.msra.gmra.mrb[30].mxu0 %vm1966_vm6, %v1964_v58 }
 0x6f7   :  { %2043 = vmatprep.mubr.f32.mxu1 %v4188_v49  ;;  %2120 = vmatprep.mubr.f32.mxu0 %v4188_v49 }
 0x6fa   :  { %2209 = vmatmul.mubr.msk.f32.gmra.mrb[36].mxu1 %vm1966_vm6, %v1965_v18  ;;  %2211 = vmatmul.mubr.msk.f32.gmra.mrb[36].mxu0 %vm1966_vm6, %v1965_v18 }
 0x7c1   :  { %v1912_v7 = vpop.f32.mrb[32].mxu1  ;;  %v1955_v3 = vpop.f32.mrb[32].mxu0 }
 0x7c2   :  { %v1914_v28 = vpop.f32.mrb[33].mxu1  ;;  %v1957_v31 = vpop.f32.mrb[33].mxu0 }
 0x7c3   :  { %v1916_v45 = vpop.f32.mrb[34].mxu1  ;;  %v1959_v26 = vpop.f32.mrb[34].mxu0 }
 0x7c4   :  { %v1918_v61 = vpop.f32.mrb[35].mxu1  ;;  %v1961_v23 = vpop.f32.mrb[35].mxu0 }
 0x7c9   :  { %v2039_v1 = vpop.f32.mrb[30].mxu1  ;;  %v2116_v41 = vpop.f32.mrb[30].mxu0 }
 0x7ca   :  { %v2040_v29 = vadd.f32 %v2039_v1, %v1912_v7  ;;  %v2041_v12 = vpop.f32.mrb[31].mxu1  ;;  %v2117_v30 = vadd.f32 %v2116_v41, %v1955_v3  ;;  %v2118_v57 = vpop.f32.mrb[31].mxu0 }
 0x7cb   :  { %v2042_v24 = vadd.f32 %v2041_v12, %v1914_v28  ;;  %v2119_v32 = vadd.f32 %v2118_v57, %v1957_v31 }
 0x7cc   :  { %v2135_v49 = vadd.f32 %v2129_v55, %v2040_v29  ;;  %v2137_v36 = vadd.f32 %v2129_v55, %v2117_v30 }
 0x7cd   :  { %v2136_v60 = vadd.f32 %v2129_v55, %v2042_v24  ;;  %v2138_v22 = vadd.f32 %v2129_v55, %v2119_v32  ;;  %v2045_v33 = vpop.f32.mrb[36].mxu1  ;;  %v2122_v48 = vpop.f32.mrb[36].mxu0 }
 0x7ce   :  { %2143 = vst [vmem:[#allocation2] sm:$0xff] %v2135_v49  ;;  %2145 = vst [vmem:[#allocation2 + $0x10] sm:$0xff] %v2137_v36  ;;  %v2046_v38 = vadd.f32 %v2045_v33, %v1916_v45  ;;  %v2047_v11 = vpop.f32.mrb[37].mxu1  ;;  %v2123_v39 = vadd.f32 %v2122_v48, %v1959_v26  ;;  %v2124_v51 = vpop.f32.mrb[37].mxu0 }
 0x7cf   :  { %2144 = vst [vmem:[#allocation2 + $0x8] sm:$0xff] %v2136_v60  ;;  %2146 = vst [vmem:[#allocation2 + $0x18] sm:$0xff] %v2138_v22  ;;  %v2048_v21 = vadd.f32 %v2047_v11, %v1918_v61  ;;  %v2125_v54 = vadd.f32 %v2124_v51, %v1961_v23 }
 0x7d0   :  { %v2139_v13 = vadd.f32 %v2133_v40, %v2046_v38  ;;  %v2141_v6 = vadd.f32 %v2133_v40, %v2123_v39 }
 0x7d1   :  { %v2140_v4 = vadd.f32 %v2133_v40, %v2048_v21  ;;  %v2142_v0 = vadd.f32 %v2133_v40, %v2125_v54 }
 0x7d2   :  { %2147 = vst [vmem:[#allocation2 + $0x20] sm:$0xff] %v2139_v13  ;;  %2149 = vst [vmem:[#allocation2 + $0x30] sm:$0xff] %v2141_v6 }
 0x7d3   :  { %2148 = vst [vmem:[#allocation2 + $0x28] sm:$0xff] %v2140_v4  ;;  %2150 = vst [vmem:[#allocation2 + $0x38] sm:$0xff] %v2142_v0 }
 0x7d4   :  { %2842 = shalt.err (!%p2839_p4)
}
 0x7d5   :  { %s2843_s20 = scalar_lea.hbm %s4044_s9, 1024 }
 0x7d6   :  { %p2844_p5 = scmp.ne.s32.totalorder %s4044_s9, %s2843_s20  ;;  %p2847_p6 = scmp.lt.u32.totalorder %s2843_s20, %s4044_s9 }
 0x7d8   :  { %p2849_p7 = pnand %p2847_p6, %p2844_p5 }
 0x7da   :  { %2852 = shalt.err (!%p2849_p7)
}
 0x7db   :  { %s2872_s11 = smov 512   ;;  %s2873_s12 = smov 32  }
 0x7dc   :  { %2162 = dma.vmem_to_hbm [thread:$0]  %s2157_s8, 1024, %s4044_s9, [#allocation3], %s2872_s11, %s2872_s11, %s2873_s12  }
 0x7dd   :  { %2853 = dma.done.wait [#allocation3], 1024  }
 0x7de   :  { %2854 = vsyncadd [#allocation3], 4294966272 }
 0x7df   :  { %2166 = vsyncpa [#allocation3], 1 }

</bundles_post_ra>
